<compile_context>
chip_gen: v5e
topology: v5e:2x2
jax: 0.10.0
libtpu: 0.0.40
codegen_flags: <defaults>
</compile_context>

<pallas_src>
import jax
import jax.numpy as jnp
from jax import lax
from jax.experimental import pallas as pl
from jax.experimental.pallas import tpu as pltpu

_LANE = 128
_SUBLANE = 8


def _round_up(x, m):
    return (x + m - 1) // m * m


def _interp_kernel(idx_ref, wgt_ref, fm_ref, out_ref, w_ref):
    """One grid step.

    idx_ref: (b_tile, 4, n_tile) int32  flattened corner indices (-1 => never matches)
    wgt_ref: (b_tile, 4, n_tile) f32    masked bilinear corner weights
    fm_ref : (b_tile, c_tile, HW)       flattened feature-map block
    out_ref: (b_tile, c_tile, n_tile)
    w_ref  : (b_tile, HW, n_tile)       scratch: fused one-hot weights (K-major)
    """
    b_tile, hw, n_tile = w_ref.shape

    # Build the fused weight matrix once per (batch, n) tile; reused across C tiles.
    @pl.when(pl.program_id(2) == 0)
    def _build_weights():
        # Sublane axis = HW (contraction K), lane axis = n_tile (dense 128-wide).
        iota = lax.broadcasted_iota(jnp.int32, (hw, n_tile), 0)
        for b in range(b_tile):
            idx_b = idx_ref[b]                                   # (4, n_tile) int32
            wgt_b = wgt_ref[b]                                   # (4, n_tile) f32
            w = jnp.where(iota == idx_b[0:1, :], wgt_b[0:1, :], 0.0)
            for k in range(1, 4):
                w = w + jnp.where(iota == idx_b[k:k + 1, :], wgt_b[k:k + 1, :], 0.0)
            w_ref[b] = w.astype(w_ref.dtype)

    # Canonical MXU contraction: (c_tile, HW) @ (HW, n_tile) per folded batch.
    for b in range(b_tile):
        out = lax.dot_general(fm_ref[b], w_ref[b],
                              dimension_numbers=(((1,), (0,)), ((), ())),
                              preferred_element_type=jnp.float32)
        out_ref[b] = out.astype(out_ref.dtype)


def interpolation_layer(fm, cp_loc, scale, *, b_tile=None, c_tile=None, n_tile=None,
                        stream_dtype=None,
                        fm_block_target_bytes=2 * 1024 * 1024,
                        w_scratch_target_bytes=4 * 1024 * 1024):
    """Pallas implementation of InterpolationLayer.forward.

    fm: (B, C, H, W); cp_loc: (B, N, 2) with last dim (x, y); returns (B, C, N).
    """
    B, C, H, W = fm.shape
    N = cp_loc.shape[1]
    HW = H * W

    # ----- host-side (plain JAX) corner index / weight preparation -------------------
    # Fold scale + (exactly cancelling) align_corners normalization into pixel coords.
    loc = (cp_loc.astype(jnp.float32) + 1.0) / scale - 1.0
    x = loc[..., 0]                        # (B, N) -> W axis
    y = loc[..., 1]                        # (B, N) -> H axis
    x0 = jnp.floor(x)
    y0 = jnp.floor(y)
    tx = x - x0
    ty = y - y0
    idx_list, wgt_list = [], []
    for dy in (0, 1):
        for dx in (0, 1):
            cx = x0 + dx
            cy = y0 + dy
            w_corner = (tx if dx else 1.0 - tx) * (ty if dy else 1.0 - ty)
            valid = (cx >= 0) & (cx <= W - 1) & (cy >= 0) & (cy <= H - 1)
            # Out-of-bounds corners MUST be masked: y*W+x wraps back into range.
            flat = cy * W + cx
            idx_list.append(jnp.where(valid, flat, -1.0).astype(jnp.int32))
            wgt_list.append(jnp.where(valid, w_corner, 0.0).astype(jnp.float32))
    idx = jnp.stack(idx_list, axis=1)      # (B, 4, N) int32
    wgt = jnp.stack(wgt_list, axis=1)      # (B, 4, N) f32

    # ----- tiling heuristics ----------------------------------------------------------
    fm_dtype = stream_dtype if stream_dtype is not None else fm.dtype
    fm_flat = fm.reshape(B, C, HW).astype(fm_dtype)
    fm_itemsize = jnp.dtype(fm_dtype).itemsize
    out_itemsize = jnp.dtype(fm.dtype).itemsize
    w_dtype = jnp.bfloat16 if fm_dtype == jnp.bfloat16 else jnp.float32
    w_itemsize = jnp.dtype(w_dtype).itemsize

    per_batch_bytes = C * HW * fm_itemsize
    if b_tile is None:
        b_tile = 1
        if per_batch_bytes <= 512 * 1024:
            # Small per-batch fm: fold batches into one block so the per-step DMA is
            # not dominated by fixed grid-step overhead.
            cap = max(1, fm_block_target_bytes // max(per_batch_bytes, 1))
            for d in range(1, B + 1):
                if B % d == 0 and d <= cap:
                    b_tile = d
    if c_tile is None:
        if b_tile > 1 or per_batch_bytes <= fm_block_target_bytes:
            c_tile = C
        else:
            # MXU-aligned C tile (multiple of 128 when possible), budget-bounded.
            max_rows = max(_SUBLANE,
                           (fm_block_target_bytes // (HW * fm_itemsize))
                           // _SUBLANE * _SUBLANE)
            if max_rows >= _LANE:
                max_rows = max_rows // _LANE * _LANE
            c_tile = min(max_rows, _round_up(C, _SUBLANE))
    num_b = B // b_tile
    num_c = pl.cdiv(C, c_tile)

    n_pad = max(_LANE, _round_up(N, _LANE))
    if n_tile is None:
        # Bound the (b_tile, HW, n_tile) weight scratch.
        max_n = max(_LANE,
                    (w_scratch_target_bytes // max(b_tile * HW * 4, 1)) // _LANE * _LANE)
        n_tile = min(n_pad, max_n)
    n_pad = _round_up(n_pad, n_tile)
    num_n = n_pad // n_tile

    # Padded control points: index -1 (never matches), weight 0 -> zero output, sliced off.
    idx = jnp.pad(idx, ((0, 0), (0, 0), (0, n_pad - N)), constant_values=-1)
    wgt = jnp.pad(wgt, ((0, 0), (0, 0), (0, n_pad - N)), constant_values=0.0)

    # ----- explicit VMEM budget (double-buffered blocks + scratch + build temporaries) -
    fm_block_bytes = b_tile * c_tile * HW * fm_itemsize
    out_block_bytes = b_tile * c_tile * n_tile * out_itemsize
    idxwgt_bytes = b_tile * _SUBLANE * n_tile * (4 + 4)
    w_scratch_bytes = b_tile * HW * n_tile * w_itemsize
    build_tmp_bytes = 3 * HW * n_tile * 4
    vmem_need = (2 * (fm_block_bytes + out_block_bytes + idxwgt_bytes)
                 + w_scratch_bytes + build_tmp_bytes)
    vmem_limit = int(min(max(vmem_need * 5 // 4 + (2 << 20), 16 << 20), 64 << 20))

    out = pl.pallas_call(
        _interp_kernel,
        out_shape=jax.ShapeDtypeStruct((B, C, n_pad), fm.dtype),
        grid=(num_b, num_n, num_c),
        in_specs=[
            pl.BlockSpec((b_tile, 4, n_tile), lambda bi, ni, ci: (bi, 0, ni)),    # corner idx
            pl.BlockSpec((b_tile, 4, n_tile), lambda bi, ni, ci: (bi, 0, ni)),    # corner wgt
            pl.BlockSpec((b_tile, c_tile, HW), lambda bi, ni, ci: (bi, ci, 0)),   # flat fm
        ],
        out_specs=pl.BlockSpec((b_tile, c_tile, n_tile), lambda bi, ni, ci: (bi, ci, ni)),
        scratch_shapes=[pltpu.VMEM((b_tile, HW, n_tile), w_dtype)],               # fused weights
        compiler_params=pltpu.CompilerParams(
            dimension_semantics=("parallel", "parallel", "arbitrary"),
            vmem_limit_bytes=vmem_limit),
        cost_estimate=pl.CostEstimate(
            flops=2 * B * C * HW * n_pad,
            transcendentals=0,
            bytes_accessed=(B * C * HW * fm_itemsize + B * 8 * n_pad * 8
                            + B * C * n_pad * out_itemsize)),
    )(idx, wgt, fm_flat)
    return out[:, :, :N]


def ref_interpolation(fm, cp_loc, scale):
    """Pure-JAX reference of grid_sample(bilinear, zeros, align_corners=True)."""
    B, C, H, W = fm.shape
    loc = (cp_loc + 1.0) / scale - 1.0
    x = loc[..., 0]
    y = loc[..., 1]
    x0 = jnp.floor(x)
    y0 = jnp.floor(y)
    wx1 = x - x0
    wx0 = 1.0 - wx1
    wy1 = y - y0
    wy0 = 1.0 - wy1

    def corner(fm_b, ix, iy):
        valid = (ix >= 0) & (ix <= W - 1) & (iy >= 0) & (iy <= H - 1)
        ixc = jnp.clip(ix, 0, W - 1).astype(jnp.int32)
        iyc = jnp.clip(iy, 0, H - 1).astype(jnp.int32)
        v = fm_b[:, iyc, ixc]                    # (C, N)
        return v * valid[None, :].astype(fm_b.dtype)

    def per_batch(fm_b, x0b, y0b, wx0b, wx1b, wy0b, wy1b):
        v00 = corner(fm_b, x0b, y0b)
        v01 = corner(fm_b, x0b + 1, y0b)
        v10 = corner(fm_b, x0b, y0b + 1)
        v11 = corner(fm_b, x0b + 1, y0b + 1)
        return (v00 * (wx0b * wy0b)[None, :] + v01 * (wx1b * wy0b)[None, :]
                + v10 * (wx0b * wy1b)[None, :] + v11 * (wx1b * wy1b)[None, :])

    return jax.vmap(per_batch)(fm, x0, y0, wx0, wx1, wy0, wy1)


if __name__ == "__main__":
    key = jax.random.PRNGKey(0)
    scale = 2.0

    # Case 1: square feature map, batch-folded path (b_tile = B).
    B, C, H, W, N = 2, 4, 16, 16, 8
    k_fm, k_cp, key = jax.random.split(key, 3)
    fm = jax.random.normal(k_fm, (B, C, H, W), dtype=jnp.float32)
    cp_loc = jax.random.uniform(k_cp, (B, N, 2), dtype=jnp.float32,
                                minval=-1.5, maxval=2.0 * (W - 1) + 1.5)
    out = jax.block_until_ready(interpolation_layer(fm, cp_loc, scale))
    ref = ref_interpolation(fm, cp_loc, scale)
    assert out.shape == (B, C, N)
    assert jnp.allclose(out, ref, atol=1e-5, rtol=1e-5), (
        f"square case max abs err {jnp.max(jnp.abs(out - ref))}")

    # Case 2: non-square feature map (catches x/W vs y/H axis swaps).
    B2, C2, H2, W2, N2 = 2, 8, 16, 24, 5
    k_fm2, k_cp2, key = jax.random.split(key, 3)
    fm2 = jax.random.normal(k_fm2, (B2, C2, H2, W2), dtype=jnp.float32)
    cp2 = jax.random.uniform(k_cp2, (B2, N2, 2), dtype=jnp.float32,
                             minval=-1.5, maxval=2.0 * (W2 - 1) + 1.5)
    out2 = jax.block_until_ready(interpolation_layer(fm2, cp2, scale))
    ref2 = ref_interpolation(fm2, cp2, scale)
    assert out2.shape == (B2, C2, N2)
    assert jnp.allclose(out2, ref2, atol=1e-5, rtol=1e-5), (
        f"non-square case max abs err {jnp.max(jnp.abs(out2 - ref2))}")

    # Case 3: forced C tiling (partial last tile) exercising the scratch-reuse path.
    B3, C3, H3, W3, N3 = 1, 40, 8, 16, 20
    k_fm3, k_cp3, key = jax.random.split(key, 3)
    fm3 = jax.random.normal(k_fm3, (B3, C3, H3, W3), dtype=jnp.float32)
    cp3 = jax.random.uniform(k_cp3, (B3, N3, 2), dtype=jnp.float32,
                             minval=-1.5, maxval=2.0 * (W3 - 1) + 1.5)
    out3 = jax.block_until_ready(
        interpolation_layer(fm3, cp3, scale, b_tile=1, c_tile=16))
    ref3 = ref_interpolation(fm3, cp3, scale)
    assert out3.shape == (B3, C3, N3)
    assert jnp.allclose(out3, ref3, atol=1e-5, rtol=1e-5), (
        f"c-tiled case max abs err {jnp.max(jnp.abs(out3 - ref3))}")

    print("KERNEL_OK")
</pallas_src>

<mosaic_0001>
module attributes {stable_mosaic.version = 11 : i64} {
  func.func @_interp_kernel(%arg0: i32, %arg1: i32, %arg2: i32, %arg3: memref<2x4x128xi32, #tpu.memory_space<vmem>>, %arg4: memref<2x4x128xf32, #tpu.memory_space<vmem>>, %arg5: memref<2x4x256xf32, #tpu.memory_space<vmem>>, %arg6: memref<2x4x128xf32, #tpu.memory_space<vmem>>, %arg7: memref<2x256x128xf32, #tpu.memory_space<vmem>>) attributes {dimension_semantics = [#tpu.dimension_semantics<parallel>, #tpu.dimension_semantics<parallel>, #tpu.dimension_semantics<arbitrary>], iteration_bounds = array<i64: 1, 1, 1>, scalar_prefetch = 0 : i64, scratch_operands = 1 : i64, tpu.core_type = #tpu.core_type<tc>, window_params = [{transform_indices = @transform_0, window_bounds = array<i64: 2, 4, 128>}, {transform_indices = @transform_1, window_bounds = array<i64: 2, 4, 128>}, {transform_indices = @transform_2, window_bounds = array<i64: 2, 4, 256>}, {transform_indices = @transform_3, window_bounds = array<i64: 2, 4, 128>}]} {
    %c0_i32 = arith.constant 0 : i32
    %0 = arith.cmpi eq, %arg2, %c0_i32 : i32
    %1 = arith.extui %0 : i1 to i32
    %c0_i32_0 = arith.constant 0 : i32
    %2 = arith.cmpi ne, %1, %c0_i32_0 : i32
    scf.if %2 {
      %19 = tpu.iota {dimensions = array<i32: 0>} : vector<256x128xi32>
      %c0_18 = arith.constant 0 : index
      %c0_19 = arith.constant 0 : index
      %c0_20 = arith.constant 0 : index
      %20 = vector.load %arg3[%c0_18, %c0_19, %c0_20] : memref<2x4x128xi32, #tpu.memory_space<vmem>>, vector<1x4x128xi32>
      %21 = vector.shape_cast %20 : vector<1x4x128xi32> to vector<4x128xi32>
      %c0_21 = arith.constant 0 : index
      %c0_22 = arith.constant 0 : index
      %c0_23 = arith.constant 0 : index
      %22 = vector.load %arg4[%c0_21, %c0_22, %c0_23] : memref<2x4x128xf32, #tpu.memory_space<vmem>>, vector<1x4x128xf32>
      %23 = vector.shape_cast %22 : vector<1x4x128xf32> to vector<4x128xf32>
      %24 = vector.extract_strided_slice %21 {offsets = [0, 0], sizes = [1, 128], strides = [1, 1]} : vector<4x128xi32> to vector<1x128xi32>
      %25 = vector.broadcast %24 : vector<1x128xi32> to vector<256x128xi32>
      %26 = arith.cmpi eq, %19, %25 : vector<256x128xi32>
      %27 = vector.extract_strided_slice %23 {offsets = [0, 0], sizes = [1, 128], strides = [1, 1]} : vector<4x128xf32> to vector<1x128xf32>
      %cst_24 = arith.constant 0.000000e+00 : f32
      %28 = vector.shape_cast %27 : vector<1x128xf32> to vector<1x128xf32>
      %29 = vector.broadcast %28 : vector<1x128xf32> to vector<256x128xf32>
      %30 = vector.broadcast %cst_24 : f32 to vector<256x128xf32>
      %31 = arith.select %26, %29, %30 : vector<256x128xi1>, vector<256x128xf32>
      %32 = vector.extract_strided_slice %21 {offsets = [1, 0], sizes = [1, 128], strides = [1, 1]} : vector<4x128xi32> to vector<1x128xi32>
      %33 = vector.broadcast %32 : vector<1x128xi32> to vector<256x128xi32>
      %34 = arith.cmpi eq, %19, %33 : vector<256x128xi32>
      %35 = vector.extract_strided_slice %23 {offsets = [1, 0], sizes = [1, 128], strides = [1, 1]} : vector<4x128xf32> to vector<1x128xf32>
      %cst_25 = arith.constant 0.000000e+00 : f32
      %36 = vector.shape_cast %35 : vector<1x128xf32> to vector<1x128xf32>
      %37 = vector.broadcast %36 : vector<1x128xf32> to vector<256x128xf32>
      %38 = vector.broadcast %cst_25 : f32 to vector<256x128xf32>
      %39 = arith.select %34, %37, %38 : vector<256x128xi1>, vector<256x128xf32>
      %40 = arith.addf %31, %39 : vector<256x128xf32>
      %41 = vector.extract_strided_slice %21 {offsets = [2, 0], sizes = [1, 128], strides = [1, 1]} : vector<4x128xi32> to vector<1x128xi32>
      %42 = vector.broadcast %41 : vector<1x128xi32> to vector<256x128xi32>
      %43 = arith.cmpi eq, %19, %42 : vector<256x128xi32>
      %44 = vector.extract_strided_slice %23 {offsets = [2, 0], sizes = [1, 128], strides = [1, 1]} : vector<4x128xf32> to vector<1x128xf32>
      %cst_26 = arith.constant 0.000000e+00 : f32
      %45 = vector.shape_cast %44 : vector<1x128xf32> to vector<1x128xf32>
      %46 = vector.broadcast %45 : vector<1x128xf32> to vector<256x128xf32>
      %47 = vector.broadcast %cst_26 : f32 to vector<256x128xf32>
      %48 = arith.select %43, %46, %47 : vector<256x128xi1>, vector<256x128xf32>
      %49 = arith.addf %40, %48 : vector<256x128xf32>
      %50 = vector.extract_strided_slice %21 {offsets = [3, 0], sizes = [1, 128], strides = [1, 1]} : vector<4x128xi32> to vector<1x128xi32>
      %51 = vector.broadcast %50 : vector<1x128xi32> to vector<256x128xi32>
      %52 = arith.cmpi eq, %19, %51 : vector<256x128xi32>
      %53 = vector.extract_strided_slice %23 {offsets = [3, 0], sizes = [1, 128], strides = [1, 1]} : vector<4x128xf32> to vector<1x128xf32>
      %cst_27 = arith.constant 0.000000e+00 : f32
      %54 = vector.shape_cast %53 : vector<1x128xf32> to vector<1x128xf32>
      %55 = vector.broadcast %54 : vector<1x128xf32> to vector<256x128xf32>
      %56 = vector.broadcast %cst_27 : f32 to vector<256x128xf32>
      %57 = arith.select %52, %55, %56 : vector<256x128xi1>, vector<256x128xf32>
      %58 = arith.addf %49, %57 : vector<256x128xf32>
      %c0_28 = arith.constant 0 : index
      %c0_29 = arith.constant 0 : index
      %c0_30 = arith.constant 0 : index
      %59 = vector.load %arg7[%c0_28, %c0_29, %c0_30] : memref<2x256x128xf32, #tpu.memory_space<vmem>>, vector<1x256x128xf32>
      %60 = vector.shape_cast %59 : vector<1x256x128xf32> to vector<256x128xf32>
      %61 = vector.shape_cast %58 : vector<256x128xf32> to vector<1x256x128xf32>
      tpu.vector_store %arg7[%c0_28, %c0_29, %c0_30], %61 {strides = array<i32>} : memref<2x256x128xf32, #tpu.memory_space<vmem>>, vector<1x256x128xf32>,
      %c1_31 = arith.constant 1 : index
      %c0_32 = arith.constant 0 : index
      %c0_33 = arith.constant 0 : index
      %62 = vector.load %arg3[%c1_31, %c0_32, %c0_33] : memref<2x4x128xi32, #tpu.memory_space<vmem>>, vector<1x4x128xi32>
      %63 = vector.shape_cast %62 : vector<1x4x128xi32> to vector<4x128xi32>
      %c1_34 = arith.constant 1 : index
      %c0_35 = arith.constant 0 : index
      %c0_36 = arith.constant 0 : index
      %64 = vector.load %arg4[%c1_34, %c0_35, %c0_36] : memref<2x4x128xf32, #tpu.memory_space<vmem>>, vector<1x4x128xf32>
      %65 = vector.shape_cast %64 : vector<1x4x128xf32> to vector<4x128xf32>
      %66 = vector.extract_strided_slice %63 {offsets = [0, 0], sizes = [1, 128], strides = [1, 1]} : vector<4x128xi32> to vector<1x128xi32>
      %67 = vector.broadcast %66 : vector<1x128xi32> to vector<256x128xi32>
      %68 = arith.cmpi eq, %19, %67 : vector<256x128xi32>
      %69 = vector.extract_strided_slice %65 {offsets = [0, 0], sizes = [1, 128], strides = [1, 1]} : vector<4x128xf32> to vector<1x128xf32>
      %cst_37 = arith.constant 0.000000e+00 : f32
      %70 = vector.shape_cast %69 : vector<1x128xf32> to vector<1x128xf32>
      %71 = vector.broadcast %70 : vector<1x128xf32> to vector<256x128xf32>
      %72 = vector.broadcast %cst_37 : f32 to vector<256x128xf32>
      %73 = arith.select %68, %71, %72 : vector<256x128xi1>, vector<256x128xf32>
      %74 = vector.extract_strided_slice %63 {offsets = [1, 0], sizes = [1, 128], strides = [1, 1]} : vector<4x128xi32> to vector<1x128xi32>
      %75 = vector.broadcast %74 : vector<1x128xi32> to vector<256x128xi32>
      %76 = arith.cmpi eq, %19, %75 : vector<256x128xi32>
      %77 = vector.extract_strided_slice %65 {offsets = [1, 0], sizes = [1, 128], strides = [1, 1]} : vector<4x128xf32> to vector<1x128xf32>
      %cst_38 = arith.constant 0.000000e+00 : f32
      %78 = vector.shape_cast %77 : vector<1x128xf32> to vector<1x128xf32>
      %79 = vector.broadcast %78 : vector<1x128xf32> to vector<256x128xf32>
      %80 = vector.broadcast %cst_38 : f32 to vector<256x128xf32>
      %81 = arith.select %76, %79, %80 : vector<256x128xi1>, vector<256x128xf32>
      %82 = arith.addf %73, %81 : vector<256x128xf32>
      %83 = vector.extract_strided_slice %63 {offsets = [2, 0], sizes = [1, 128], strides = [1, 1]} : vector<4x128xi32> to vector<1x128xi32>
      %84 = vector.broadcast %83 : vector<1x128xi32> to vector<256x128xi32>
      %85 = arith.cmpi eq, %19, %84 : vector<256x128xi32>
      %86 = vector.extract_strided_slice %65 {offsets = [2, 0], sizes = [1, 128], strides = [1, 1]} : vector<4x128xf32> to vector<1x128xf32>
      %cst_39 = arith.constant 0.000000e+00 : f32
      %87 = vector.shape_cast %86 : vector<1x128xf32> to vector<1x128xf32>
      %88 = vector.broadcast %87 : vector<1x128xf32> to vector<256x128xf32>
      %89 = vector.broadcast %cst_39 : f32 to vector<256x128xf32>
      %90 = arith.select %85, %88, %89 : vector<256x128xi1>, vector<256x128xf32>
      %91 = arith.addf %82, %90 : vector<256x128xf32>
      %92 = vector.extract_strided_slice %63 {offsets = [3, 0], sizes = [1, 128], strides = [1, 1]} : vector<4x128xi32> to vector<1x128xi32>
      %93 = vector.broadcast %92 : vector<1x128xi32> to vector<256x128xi32>
      %94 = arith.cmpi eq, %19, %93 : vector<256x128xi32>
      %95 = vector.extract_strided_slice %65 {offsets = [3, 0], sizes = [1, 128], strides = [1, 1]} : vector<4x128xf32> to vector<1x128xf32>
      %cst_40 = arith.constant 0.000000e+00 : f32
      %96 = vector.shape_cast %95 : vector<1x128xf32> to vector<1x128xf32>
      %97 = vector.broadcast %96 : vector<1x128xf32> to vector<256x128xf32>
      %98 = vector.broadcast %cst_40 : f32 to vector<256x128xf32>
      %99 = arith.select %94, %97, %98 : vector<256x128xi1>, vector<256x128xf32>
      %100 = arith.addf %91, %99 : vector<256x128xf32>
      %c1_41 = arith.constant 1 : index
      %c0_42 = arith.constant 0 : index
      %c0_43 = arith.constant 0 : index
      %101 = vector.load %arg7[%c1_41, %c0_42, %c0_43] : memref<2x256x128xf32, #tpu.memory_space<vmem>>, vector<1x256x128xf32>
      %102 = vector.shape_cast %101 : vector<1x256x128xf32> to vector<256x128xf32>
      %103 = vector.shape_cast %100 : vector<256x128xf32> to vector<1x256x128xf32>
      tpu.vector_store %arg7[%c1_41, %c0_42, %c0_43], %103 {strides = array<i32>} : memref<2x256x128xf32, #tpu.memory_space<vmem>>, vector<1x256x128xf32>,
    } else {
    }
    %c0 = arith.constant 0 : index
    %c0_1 = arith.constant 0 : index
    %c0_2 = arith.constant 0 : index
    %3 = vector.load %arg5[%c0, %c0_1, %c0_2] : memref<2x4x256xf32, #tpu.memory_space<vmem>>, vector<1x4x256xf32>
    %4 = vector.shape_cast %3 : vector<1x4x256xf32> to vector<4x256xf32>
    %c0_3 = arith.constant 0 : index
    %c0_4 = arith.constant 0 : index
    %c0_5 = arith.constant 0 : index
    %5 = vector.load %arg7[%c0_3, %c0_4, %c0_5] : memref<2x256x128xf32, #tpu.memory_space<vmem>>, vector<1x256x128xf32>
    %6 = vector.shape_cast %5 : vector<1x256x128xf32> to vector<256x128xf32>
    %cst = arith.constant dense<0.000000e+00> : vector<4x128xf32>
    %7 = tpu.matmul %4, %6, %cst {dimension_numbers = #tpu.dot_dimension_numbers<[1], [0], [0], [1], [0, 0, 1, 1], [], []>} : vector<4x256xf32>, vector<256x128xf32>, vector<4x128xf32> -> vector<4x128xf32>
    %c0_6 = arith.constant 0 : index
    %c0_7 = arith.constant 0 : index
    %c0_8 = arith.constant 0 : index
    %8 = vector.load %arg6[%c0_6, %c0_7, %c0_8] : memref<2x4x128xf32, #tpu.memory_space<vmem>>, vector<1x4x128xf32>
    %9 = vector.shape_cast %8 : vector<1x4x128xf32> to vector<4x128xf32>
    %10 = vector.shape_cast %7 : vector<4x128xf32> to vector<1x4x128xf32>
    tpu.vector_store %arg6[%c0_6, %c0_7, %c0_8], %10 {strides = array<i32>} : memref<2x4x128xf32, #tpu.memory_space<vmem>>, vector<1x4x128xf32>,
    %c1 = arith.constant 1 : index
    %c0_9 = arith.constant 0 : index
    %c0_10 = arith.constant 0 : index
    %11 = vector.load %arg5[%c1, %c0_9, %c0_10] : memref<2x4x256xf32, #tpu.memory_space<vmem>>, vector<1x4x256xf32>
    %12 = vector.shape_cast %11 : vector<1x4x256xf32> to vector<4x256xf32>
    %c1_11 = arith.constant 1 : index
    %c0_12 = arith.constant 0 : index
    %c0_13 = arith.constant 0 : index
    %13 = vector.load %arg7[%c1_11, %c0_12, %c0_13] : memref<2x256x128xf32, #tpu.memory_space<vmem>>, vector<1x256x128xf32>
    %14 = vector.shape_cast %13 : vector<1x256x128xf32> to vector<256x128xf32>
    %cst_14 = arith.constant dense<0.000000e+00> : vector<4x128xf32>
    %15 = tpu.matmul %12, %14, %cst_14 {dimension_numbers = #tpu.dot_dimension_numbers<[1], [0], [0], [1], [0, 0, 1, 1], [], []>} : vector<4x256xf32>, vector<256x128xf32>, vector<4x128xf32> -> vector<4x128xf32>
    %c1_15 = arith.constant 1 : index
    %c0_16 = arith.constant 0 : index
    %c0_17 = arith.constant 0 : index
    %16 = vector.load %arg6[%c1_15, %c0_16, %c0_17] : memref<2x4x128xf32, #tpu.memory_space<vmem>>, vector<1x4x128xf32>
    %17 = vector.shape_cast %16 : vector<1x4x128xf32> to vector<4x128xf32>
    %18 = vector.shape_cast %15 : vector<4x128xf32> to vector<1x4x128xf32>
    tpu.vector_store %arg6[%c1_15, %c0_16, %c0_17], %18 {strides = array<i32>} : memref<2x4x128xf32, #tpu.memory_space<vmem>>, vector<1x4x128xf32>,
    return
  }
  func.func @transform_0(%arg0: i32, %arg1: i32, %arg2: i32) -> (i32, i32, i32) {
    %c0_i32 = arith.constant 0 : i32
    %c0_i32_0 = arith.constant 0 : i32
    return %arg0, %c0_i32, %arg1 : i32, i32, i32
  }
  func.func @transform_1(%arg0: i32, %arg1: i32, %arg2: i32) -> (i32, i32, i32) {
    %c0_i32 = arith.constant 0 : i32
    %c0_i32_0 = arith.constant 0 : i32
    return %arg0, %c0_i32, %arg1 : i32, i32, i32
  }
  func.func @transform_2(%arg0: i32, %arg1: i32, %arg2: i32) -> (i32, i32, i32) {
    %c0_i32 = arith.constant 0 : i32
    %c0_i32_0 = arith.constant 0 : i32
    return %arg0, %arg2, %c0_i32 : i32, i32, i32
  }
  func.func @transform_3(%arg0: i32, %arg1: i32, %arg2: i32) -> (i32, i32, i32) {
    %c0_i32 = arith.constant 0 : i32
    return %arg0, %arg2, %arg1 : i32, i32, i32
  }
}

</mosaic_0001>

<bundles_post_ra>
// kernel: tpu_custom_call.1
= control target key start
LH: loop header
LB: loop body
LE: loop exit
PB: predicated region body
PF: predicated region fallthrough
CT: control target
= control target key end

     0   :  { %8 = vsyncpa [#allocation4], 0  ;;  %s2214_s0 = inlined_call_operand.hbm [shape: s32[2,4,128], index: 0, kind: input, shape index: {}]   ;;  %s2215_s1 = inlined_call_operand.hbm [shape: f32[2,4,128], index: 1, kind: input, shape index: {}]   ;;  %s2216_s2 = inlined_call_operand.hbm [shape: f32[2,4,256], index: 2, kind: input, shape index: {}]   ;;  %s2217_s3 = inlined_call_operand.hbm [shape: f32[2,4,128], index: 3, kind: output, shape index: {}]  }
   0x1   :  { %9 = vsyncpa [#allocation7], 0 }
   0x2   :  { %10 = vsyncpa [#allocation5], 0  ;;  %s28_s14 = sshll.u32 %s2215_s1, 4  ;;  %s1183_s15 = smov [#allocation6]   ;;  %s29_s14 = int_to_ptr.hbm [resolvable:$true] %s28_s14 }
   0x3   :  { %s30_s16 = sshll.u32 %s1183_s15, 4  ;;  %s15_s19 = sshll.u32 %s2214_s0, 4  ;;  %s31_s16 = int_to_ptr.vmem [resolvable:$true] %s30_s16  ;;  %s16_s19 = int_to_ptr.hbm [resolvable:$true] %s15_s19 }
   0x4   :  { %s1184_s20 = smov 64   ;;  %s1185_s21 = smov 4  }
   0x5   :  { %36 = dma.hbm_to_vmem [thread:$0]  %s29_s14, 128, %s31_s16, [#allocation7], %s1184_s20, %s1184_s20, %s1185_s21  }
   0x6   :  { %s1186_s22 = smov [#allocation3]   ;;  %s41_s1 = sshll.u32 %s2216_s2, 4  ;;  %s42_s1 = int_to_ptr.hbm [resolvable:$true] %s41_s1 }
   0x7   :  { %s17_s23 = sshll.u32 %s1186_s22, 4  ;;  %s1187_s0 = smov [#allocation8]   ;;  %s18_s23 = int_to_ptr.vmem [resolvable:$true] %s17_s23 }
   0x8   :  { %23 = dma.hbm_to_vmem [thread:$0]  %s16_s19, 128, %s18_s23, [#allocation4], %s1184_s20, %s1184_s20, %s1185_s21  }
   0x9   :  { %s43_s26 = sshll.u32 %s1187_s0, 4  ;;  %s1188_s27 = smov 128   ;;  %s44_s26 = int_to_ptr.vmem [resolvable:$true] %s43_s26 }
   0xa   :  { %s1189_s28 = smov 8  }
   0xb   :  { %49 = dma.hbm_to_vmem [thread:$0]  %s42_s1, 256, %s44_s26, [#allocation7], %s1188_s27, %s1188_s27, %s1189_s28  }
   0xc   :  { %1177 = dma.done.wait [#allocation4], 128  }
   0xd   :  { %1178 = vsyncadd [#allocation4], 4294967168 }
   0xe   :  { %1179 = dma.done.wait [#allocation7], 384  }
   0xf   :  { %1180 = vsyncadd [#allocation7], 4294966912  ;;  %v66_v0 = vlaneseq  ;;  %v99_v10 = vld [vmem:[#allocation3] sm:$0xf]  ;;  %v100_v11 = vld [vmem:[#allocation6] sm:$0xf] }
  0x10   :  { %v494_v12 = vld [vmem:[#allocation3 + $0x4] sm:$0xf]  ;;  %v1252_v13 = vperm.slane %v99_v10, 0  ;;  %v1254_v14 = vperm.slane %v100_v11, 0  ;;  %v1256_v15 = vperm.slane %v99_v10, 1  ;;  %v1258_v16 = vperm.slane %v100_v11, 1 }
  0x11   :  { %v1226_v1 = vshrl.u32 %v66_v0, 7  ;;  %v496_v17 = vld [vmem:[#allocation6 + $0x4] sm:$0xf]  ;;  %v1260_v18 = vperm.slane %v99_v10, 2  ;;  %v1262_v19 = vperm.slane %v100_v11, 2  ;;  %v1264_v20 = vperm.slane %v99_v10, 3 }
  0x12   :  { %v1266_v21 = vperm.slane %v100_v11, 3  ;;  %v1268_v22 = vperm.slane %v494_v12, 0  ;;  %v1270_v23 = vperm.slane %v496_v17, 0  ;;  %v1272_v24 = vperm.slane %v494_v12, 1  ;;  %s1190_s2 = smov [#allocation9]   ;;  %s1059_s5 = sshll.u32 %s2217_s3, 4  ;;  %s1060_s5 = int_to_ptr.hbm [resolvable:$true] %s1059_s5 }
  0x13   :  { %v1229_v2 = vadd.s32 120, %v1226_v1  ;;  %v1232_v3 = vadd.s32 248, %v1226_v1  ;;  %v1235_v4 = vadd.s32 112, %v1226_v1  ;;  %v1238_v5 = vadd.s32 240, %v1226_v1  ;;  %s1057_s29 = sshll.u32 %s1190_s2, 4  ;;  %s1058_s29 = int_to_ptr.vmem [resolvable:$true] %s1057_s29 }
  0x14   :  { %v1241_v6 = vadd.s32 104, %v1226_v1  ;;  %v1244_v7 = vadd.s32 232, %v1226_v1  ;;  %v1247_v8 = vadd.s32 96, %v1226_v1  ;;  %v1250_v9 = vadd.s32 224, %v1226_v1 }
  0x15   :  { %v1274_v25 = vperm.slane %v496_v17, 1  ;;  %v1276_v26 = vperm.slane %v494_v12, 2  ;;  %v1278_v27 = vperm.slane %v496_v17, 2  ;;  %v1280_v28 = vperm.slane %v494_v12, 3 }
  0x16   :  { %v1282_v29 = vperm.slane %v496_v17, 3  ;;  %vm513_vm0 = vcmp.eq.s32.totalorder %v1229_v2, %v1268_v22  ;;  %vm579_vm1 = vcmp.eq.s32.totalorder %v1229_v2, %v1272_v24  ;;  %vm529_vm2 = vcmp.eq.s32.totalorder %v1232_v3, %v1268_v22 }
  0x17   :  { %vm595_vm3 = vcmp.eq.s32.totalorder %v1232_v3, %v1272_v24  ;;  %v546_v30 = vsel %vm513_vm0, %v1270_v23, 0.0  ;;  %v612_v31 = vsel %vm579_vm1, %v1274_v25, 0.0  ;;  %vm677_vm4 = vcmp.eq.s32.totalorder %v1229_v2, %v1276_v26 }
  0x18   :  { %vm775_vm5 = vcmp.eq.s32.totalorder %v1229_v2, %v1280_v28  ;;  %v644_v32 = vadd.f32 %v612_v31, %v546_v30  ;;  %v710_v33 = vsel %vm677_vm4, %v1278_v27, 0.0  ;;  %v562_v35 = vsel %vm529_vm2, %v1270_v23, 0.0 }
  0x19   :  { %v808_v34 = vsel %vm775_vm5, %v1282_v29, 0.0  ;;  %v628_v36 = vsel %vm595_vm3, %v1274_v25, 0.0  ;;  %vm693_vm6 = vcmp.eq.s32.totalorder %v1232_v3, %v1276_v26  ;;  %vm791_vm7 = vcmp.eq.s32.totalorder %v1232_v3, %v1280_v28 }
  0x1a   :  { %vm512_vm8 = vcmp.eq.s32.totalorder %v1235_v4, %v1268_v22  ;;  %v742_v37 = vadd.f32 %v710_v33, %v644_v32  ;;  %v660_v38 = vadd.f32 %v628_v36, %v562_v35  ;;  %v726_v39 = vsel %vm693_vm6, %v1278_v27, 0.0 }
  0x1b   :  { %v824_v40 = vsel %vm791_vm7, %v1282_v29, 0.0  ;;  %v545_v41 = vsel %vm512_vm8, %v1270_v23, 0.0  ;;  %vm578_vm9 = vcmp.eq.s32.totalorder %v1235_v4, %v1272_v24  ;;  %vm676_vm10 = vcmp.eq.s32.totalorder %v1235_v4, %v1276_v26 }
  0x1c   :  { %vm774_vm11 = vcmp.eq.s32.totalorder %v1235_v4, %v1280_v28  ;;  %v840_v42 = vadd.f32 %v808_v34, %v742_v37  ;;  %v758_v43 = vadd.f32 %v726_v39, %v660_v38  ;;  %v611_v44 = vsel %vm578_vm9, %v1274_v25, 0.0 }
  0x1d   :  { %v709_v45 = vsel %vm676_vm10, %v1278_v27, 0.0  ;;  %v643_v46 = vadd.f32 %v611_v44, %v545_v41  ;;  %v807_v47 = vsel %vm774_vm11, %v1282_v29, 0.0  ;;  %vm528_vm12 = vcmp.eq.s32.totalorder %v1238_v5, %v1268_v22 }
  0x1e   :  { %vm594_vm13 = vcmp.eq.s32.totalorder %v1238_v5, %v1272_v24  ;;  %1011 = vmatpush.msra.mxu2 %v840_v42  ;;  %v856_v48 = vadd.f32 %v824_v40, %v758_v43  ;;  %v561_v49 = vsel %vm528_vm12, %v1270_v23, 0.0  ;;  %vm692_vm14 = vcmp.eq.s32.totalorder %v1238_v5, %v1276_v26 }
  0x1f   :  { %v627_v50 = vsel %vm594_vm13, %v1274_v25, 0.0  ;;  %v741_v51 = vadd.f32 %v709_v45, %v643_v46  ;;  %v725_v53 = vsel %vm692_vm14, %v1278_v27, 0.0  ;;  %vm790_vm15 = vcmp.eq.s32.totalorder %v1238_v5, %v1280_v28 }
  0x20   :  { %v659_v52 = vadd.f32 %v627_v50, %v561_v49  ;;  %1031 = vmatpush.msra.mxu3 %v856_v48  ;;  %v823_v54 = vsel %vm790_vm15, %v1282_v29, 0.0  ;;  %vm511_vm0 = vcmp.eq.s32.totalorder %v1241_v6, %v1268_v22  ;;  %vm577_vm1 = vcmp.eq.s32.totalorder %v1241_v6, %v1272_v24 }
  0x21   :  { %vm675_vm2 = vcmp.eq.s32.totalorder %v1241_v6, %v1276_v26  ;;  %v839_v55 = vadd.f32 %v807_v47, %v741_v51  ;;  %v544_v57 = vsel %vm511_vm0, %v1270_v23, 0.0  ;;  %v610_v58 = vsel %vm577_vm1, %v1274_v25, 0.0 }
  0x22   :  { %v757_v56 = vadd.f32 %v725_v53, %v659_v52  ;;  %v642_v59 = vadd.f32 %v610_v58, %v544_v57  ;;  %v708_v60 = vsel %vm675_vm2, %v1278_v27, 0.0  ;;  %vm773_vm3 = vcmp.eq.s32.totalorder %v1241_v6, %v1280_v28 }
  0x23   :  { %vm527_vm4 = vcmp.eq.s32.totalorder %v1244_v7, %v1268_v22  ;;  %1012 = vmatpush.msra.mxu2 %v839_v55  ;;  %v806_v62 = vsel %vm773_vm3, %v1282_v29, 0.0  ;;  %vm593_vm5 = vcmp.eq.s32.totalorder %v1244_v7, %v1272_v24  ;;  %vm691_vm6 = vcmp.eq.s32.totalorder %v1244_v7, %v1276_v26 }
  0x24   :  { %v855_v61 = vadd.f32 %v823_v54, %v757_v56  ;;  %v560_v63 = vsel %vm527_vm4, %v1270_v23, 0.0  ;;  %v740_v0 = vadd.f32 %v708_v60, %v642_v59  ;;  %v626_v10 = vsel %vm593_vm5, %v1274_v25, 0.0 }
  0x25   :  { %vm789_vm7 = vcmp.eq.s32.totalorder %v1244_v7, %v1280_v28  ;;  %v658_v11 = vadd.f32 %v626_v10, %v560_v63  ;;  %v724_v12 = vsel %vm691_vm6, %v1278_v27, 0.0  ;;  %vm117_vm8 = vcmp.eq.s32.totalorder %v1229_v2, %v1252_v13 }
  0x26   :  { %1032 = vmatpush.msra.mxu3 %v855_v61  ;;  %v822_v17 = vsel %vm789_vm7, %v1282_v29, 0.0  ;;  %v838_v30 = vadd.f32 %v806_v62, %v740_v0  ;;  %v150_v31 = vsel %vm117_vm8, %v1254_v14, 0.0  ;;  %vm183_vm9 = vcmp.eq.s32.totalorder %v1229_v2, %v1256_v15 }
  0x27   :  { %vm281_vm10 = vcmp.eq.s32.totalorder %v1229_v2, %v1260_v18  ;;  %v756_v32 = vadd.f32 %v724_v12, %v658_v11  ;;  %v216_v33 = vsel %vm183_vm9, %v1258_v16, 0.0  ;;  %vm379_vm11 = vcmp.eq.s32.totalorder %v1229_v2, %v1264_v20 }
  0x28   :  { %v314_v34 = vsel %vm281_vm10, %v1262_v19, 0.0  ;;  %1013 = vmatpush.msra.mxu2 %v838_v30  ;;  %v248_v35 = vadd.f32 %v216_v33, %v150_v31  ;;  %v412_v36 = vsel %vm379_vm11, %v1266_v21, 0.0  ;;  %vm133_vm12 = vcmp.eq.s32.totalorder %v1232_v3, %v1252_v13 }
  0x29   :  { %vm199_vm13 = vcmp.eq.s32.totalorder %v1232_v3, %v1256_v15  ;;  %v854_v37 = vadd.f32 %v822_v17, %v756_v32  ;;  %v166_v38 = vsel %vm133_vm12, %v1254_v14, 0.0  ;;  %vm297_vm14 = vcmp.eq.s32.totalorder %v1232_v3, %v1260_v18 }
  0x2a   :  { %v232_v39 = vsel %vm199_vm13, %v1258_v16, 0.0  ;;  %v346_v40 = vadd.f32 %v314_v34, %v248_v35  ;;  %v330_v41 = vsel %vm297_vm14, %v1262_v19, 0.0  ;;  %vm395_vm15 = vcmp.eq.s32.totalorder %v1232_v3, %v1264_v20 }
  0x2b   :  { %v264_v2 = vadd.f32 %v232_v39, %v166_v38  ;;  %1033 = vmatpush.msra.mxu3 %v854_v37  ;;  %v428_v42 = vsel %vm395_vm15, %v1266_v21, 0.0  ;;  %vm510_vm0 = vcmp.eq.s32.totalorder %v1247_v8, %v1268_v22  ;;  %vm576_vm1 = vcmp.eq.s32.totalorder %v1247_v8, %v1272_v24 }
  0x2c   :  { %vm674_vm2 = vcmp.eq.s32.totalorder %v1247_v8, %v1276_v26  ;;  %v444_v43 = vadd.f32 %v412_v36, %v346_v40  ;;  %v543_v45 = vsel %vm510_vm0, %v1270_v23, 0.0  ;;  %v609_v46 = vsel %vm576_vm1, %v1274_v25, 0.0 }
  0x2d   :  { %v362_v44 = vadd.f32 %v330_v41, %v264_v2  ;;  %v641_v47 = vadd.f32 %v609_v46, %v543_v45  ;;  %v707_v3 = vsel %vm674_vm2, %v1278_v27, 0.0  ;;  %vm772_vm3 = vcmp.eq.s32.totalorder %v1247_v8, %v1280_v28 }
  0x2e   :  { %vm526_vm4 = vcmp.eq.s32.totalorder %v1250_v9, %v1268_v22  ;;  %929 = vmatpush.msra.mxu0 %v444_v43  ;;  %v805_v49 = vsel %vm772_vm3, %v1282_v29, 0.0  ;;  %vm592_vm5 = vcmp.eq.s32.totalorder %v1250_v9, %v1272_v24  ;;  %vm690_vm6 = vcmp.eq.s32.totalorder %v1250_v9, %v1276_v26 }
  0x2f   :  { %v460_v48 = vadd.f32 %v428_v42, %v362_v44  ;;  %v559_v50 = vsel %vm526_vm4, %v1270_v23, 0.0  ;;  %v739_v51 = vadd.f32 %v707_v3, %v641_v47  ;;  %v625_v52 = vsel %vm592_vm5, %v1274_v25, 0.0 }
  0x30   :  { %vm788_vm7 = vcmp.eq.s32.totalorder %v1250_v9, %v1280_v28  ;;  %v657_v53 = vadd.f32 %v625_v52, %v559_v50  ;;  %v723_v54 = vsel %vm690_vm6, %v1278_v27, 0.0  ;;  %vm116_vm8 = vcmp.eq.s32.totalorder %v1235_v4, %v1252_v13 }
  0x31   :  { %949 = vmatpush.msra.mxu1 %v460_v48  ;;  %v821_v55 = vsel %vm788_vm7, %v1282_v29, 0.0  ;;  %v837_v56 = vadd.f32 %v805_v49, %v739_v51  ;;  %v149_v57 = vsel %vm116_vm8, %v1254_v14, 0.0  ;;  %vm182_vm9 = vcmp.eq.s32.totalorder %v1235_v4, %v1256_v15 }
  0x32   :  { %vm280_vm10 = vcmp.eq.s32.totalorder %v1235_v4, %v1260_v18  ;;  %v755_v58 = vadd.f32 %v723_v54, %v657_v53  ;;  %v215_v59 = vsel %vm182_vm9, %v1258_v16, 0.0  ;;  %vm378_vm11 = vcmp.eq.s32.totalorder %v1235_v4, %v1264_v20 }
  0x33   :  { %v313_v60 = vsel %vm280_vm10, %v1262_v19, 0.0  ;;  %1014 = vmatpush.msra.mxu2 %v837_v56  ;;  %v247_v61 = vadd.f32 %v215_v59, %v149_v57  ;;  %v411_v62 = vsel %vm378_vm11, %v1266_v21, 0.0  ;;  %vm132_vm12 = vcmp.eq.s32.totalorder %v1238_v5, %v1252_v13 }
  0x34   :  { %vm198_vm13 = vcmp.eq.s32.totalorder %v1238_v5, %v1256_v15  ;;  %v853_v63 = vadd.f32 %v821_v55, %v755_v58  ;;  %v165_v0 = vsel %vm132_vm12, %v1254_v14, 0.0  ;;  %vm296_vm14 = vcmp.eq.s32.totalorder %v1238_v5, %v1260_v18 }
  0x35   :  { %v231_v10 = vsel %vm198_vm13, %v1258_v16, 0.0  ;;  %v345_v11 = vadd.f32 %v313_v60, %v247_v61  ;;  %v329_v12 = vsel %vm296_vm14, %v1262_v19, 0.0  ;;  %vm394_vm15 = vcmp.eq.s32.totalorder %v1238_v5, %v1264_v20 }
  0x36   :  { %v263_v4 = vadd.f32 %v231_v10, %v165_v0  ;;  %1034 = vmatpush.msra.mxu3 %v853_v63  ;;  %v427_v17 = vsel %vm394_vm15, %v1266_v21, 0.0  ;;  %v1429_v30 = vadd.s32 88, %v1226_v1  ;;  %v1432_v31 = vadd.s32 216, %v1226_v1 }
  0x37   :  { %vm115_vm0 = vcmp.eq.s32.totalorder %v1241_v6, %v1252_v13  ;;  %v443_v32 = vadd.f32 %v411_v62, %v345_v11  ;;  %vm181_vm1 = vcmp.eq.s32.totalorder %v1241_v6, %v1256_v15  ;;  %vm279_vm10 = vcmp.eq.s32.totalorder %v1241_v6, %v1260_v18 }
  0x38   :  { %v361_v33 = vadd.f32 %v329_v12, %v263_v4  ;;  %v148_v34 = vsel %vm115_vm0, %v1254_v14, 0.0  ;;  %vm509_vm2 = vcmp.eq.s32.totalorder %v1429_v30, %v1268_v22  ;;  %vm575_vm3 = vcmp.eq.s32.totalorder %v1429_v30, %v1272_v24 }
  0x39   :  { %vm673_vm4 = vcmp.eq.s32.totalorder %v1429_v30, %v1276_v26  ;;  %vm771_vm5 = vcmp.eq.s32.totalorder %v1429_v30, %v1280_v28  ;;  %930 = vmatpush.msra.mxu0 %v443_v32  ;;  %v542_v35 = vsel %vm509_vm2, %v1270_v23, 0.0  ;;  %v608_v36 = vsel %vm575_vm3, %v1274_v25, 0.0 }
  0x3a   :  { %v459_v5 = vadd.f32 %v427_v17, %v361_v33  ;;  %v706_v37 = vsel %vm673_vm4, %v1278_v27, 0.0  ;;  %v640_v38 = vadd.f32 %v608_v36, %v542_v35  ;;  %v804_v39 = vsel %vm771_vm5, %v1282_v29, 0.0 }
  0x3b   :  { %vm525_vm6 = vcmp.eq.s32.totalorder %v1432_v31, %v1268_v22  ;;  %vm591_vm7 = vcmp.eq.s32.totalorder %v1432_v31, %v1272_v24  ;;  %vm689_vm8 = vcmp.eq.s32.totalorder %v1432_v31, %v1276_v26  ;;  %vm787_vm9 = vcmp.eq.s32.totalorder %v1432_v31, %v1280_v28 }
  0x3c   :  { %950 = vmatpush.msra.mxu1 %v459_v5  ;;  %v558_v40 = vsel %vm525_vm6, %v1270_v23, 0.0  ;;  %v624_v2 = vsel %vm591_vm7, %v1274_v25, 0.0  ;;  %v738_v41 = vadd.f32 %v706_v37, %v640_v38  ;;  %v722_v43 = vsel %vm689_vm8, %v1278_v27, 0.0 }
  0x3d   :  { %v656_v42 = vadd.f32 %v624_v2, %v558_v40  ;;  %v820_v44 = vsel %vm787_vm9, %v1282_v29, 0.0  ;;  %v214_v45 = vsel %vm181_vm1, %v1258_v16, 0.0  ;;  %vm377_vm11 = vcmp.eq.s32.totalorder %v1241_v6, %v1264_v20 }
  0x3e   :  { %vm131_vm12 = vcmp.eq.s32.totalorder %v1244_v7, %v1252_v13  ;;  %v836_v46 = vadd.f32 %v804_v39, %v738_v41  ;;  %v246_v3 = vadd.f32 %v214_v45, %v148_v34  ;;  %v312_v48 = vsel %vm279_vm10, %v1262_v19, 0.0 }
  0x3f   :  { %v754_v47 = vadd.f32 %v722_v43, %v656_v42  ;;  %v410_v49 = vsel %vm377_vm11, %v1266_v21, 0.0  ;;  %v164_v50 = vsel %vm131_vm12, %v1254_v14, 0.0  ;;  %vm197_vm13 = vcmp.eq.s32.totalorder %v1244_v7, %v1256_v15 }
  0x40   :  { %vm295_vm14 = vcmp.eq.s32.totalorder %v1244_v7, %v1260_v18  ;;  %1015 = vmatpush.msra.mxu2 %v836_v46  ;;  %v344_v51 = vadd.f32 %v312_v48, %v246_v3  ;;  %v230_v52 = vsel %vm197_vm13, %v1258_v16, 0.0  ;;  %vm393_vm15 = vcmp.eq.s32.totalorder %v1244_v7, %v1264_v20 }
  0x41   :  { %v852_v6 = vadd.f32 %v820_v44, %v754_v47  ;;  %v328_v53 = vsel %vm295_vm14, %v1262_v19, 0.0  ;;  %v262_v54 = vadd.f32 %v230_v52, %v164_v50  ;;  %v1485_v55 = vadd.s32 80, %v1226_v1 }
  0x42   :  { %v1488_v56 = vadd.s32 208, %v1226_v1  ;;  %v442_v57 = vadd.f32 %v410_v49, %v344_v51  ;;  %v426_v58 = vsel %vm393_vm15, %v1266_v21, 0.0  ;;  %vm114_vm0 = vcmp.eq.s32.totalorder %v1247_v8, %v1252_v13 }
  0x43   :  { %1035 = vmatpush.msra.mxu3 %v852_v6  ;;  %vm180_vm1 = vcmp.eq.s32.totalorder %v1247_v8, %v1256_v15  ;;  %v360_v59 = vadd.f32 %v328_v53, %v262_v54  ;;  %vm508_vm2 = vcmp.eq.s32.totalorder %v1485_v55, %v1268_v22  ;;  %vm574_vm3 = vcmp.eq.s32.totalorder %v1485_v55, %v1272_v24 }
  0x44   :  { %vm672_vm4 = vcmp.eq.s32.totalorder %v1485_v55, %v1276_v26  ;;  %931 = vmatpush.msra.mxu0 %v442_v57  ;;  %v541_v7 = vsel %vm508_vm2, %v1270_v23, 0.0  ;;  %v607_v60 = vsel %vm574_vm3, %v1274_v25, 0.0  ;;  %vm770_vm5 = vcmp.eq.s32.totalorder %v1485_v55, %v1280_v28 }
  0x45   :  { %v705_v61 = vsel %vm672_vm4, %v1278_v27, 0.0  ;;  %v458_v62 = vadd.f32 %v426_v58, %v360_v59  ;;  %v639_v63 = vadd.f32 %v607_v60, %v541_v7  ;;  %v803_v0 = vsel %vm770_vm5, %v1282_v29, 0.0 }
  0x46   :  { %vm524_vm6 = vcmp.eq.s32.totalorder %v1488_v56, %v1268_v22  ;;  %vm590_vm7 = vcmp.eq.s32.totalorder %v1488_v56, %v1272_v24  ;;  %vm688_vm8 = vcmp.eq.s32.totalorder %v1488_v56, %v1276_v26  ;;  %vm786_vm9 = vcmp.eq.s32.totalorder %v1488_v56, %v1280_v28 }
  0x47   :  { %v557_v10 = vsel %vm524_vm6, %v1270_v23, 0.0  ;;  %951 = vmatpush.msra.mxu1 %v458_v62  ;;  %v737_v11 = vadd.f32 %v705_v61, %v639_v63  ;;  %v623_v4 = vsel %vm590_vm7, %v1274_v25, 0.0  ;;  %v721_v12 = vsel %vm688_vm8, %v1278_v27, 0.0 }
  0x48   :  { %v819_v17 = vsel %vm786_vm9, %v1282_v29, 0.0  ;;  %v655_v32 = vadd.f32 %v623_v4, %v557_v10  ;;  %v147_v33 = vsel %vm114_vm0, %v1254_v14, 0.0  ;;  %v213_v34 = vsel %vm180_vm1, %v1258_v16, 0.0 }
  0x49   :  { %vm278_vm10 = vcmp.eq.s32.totalorder %v1247_v8, %v1260_v18  ;;  %v835_v5 = vadd.f32 %v803_v0, %v737_v11  ;;  %v245_v35 = vadd.f32 %v213_v34, %v147_v33  ;;  %vm376_vm11 = vcmp.eq.s32.totalorder %v1247_v8, %v1264_v20 }
  0x4a   :  { %v311_v36 = vsel %vm278_vm10, %v1262_v19, 0.0  ;;  %v753_v37 = vadd.f32 %v721_v12, %v655_v32  ;;  %v409_v38 = vsel %vm376_vm11, %v1266_v21, 0.0  ;;  %vm130_vm12 = vcmp.eq.s32.totalorder %v1250_v9, %v1252_v13 }
  0x4b   :  { %vm196_vm13 = vcmp.eq.s32.totalorder %v1250_v9, %v1256_v15  ;;  %1016 = vmatpush.msra.mxu2 %v835_v5  ;;  %v343_v39 = vadd.f32 %v311_v36, %v245_v35  ;;  %v163_v40 = vsel %vm130_vm12, %v1254_v14, 0.0  ;;  %vm294_vm14 = vcmp.eq.s32.totalorder %v1250_v9, %v1260_v18 }
  0x4c   :  { %v229_v2 = vsel %vm196_vm13, %v1258_v16, 0.0  ;;  %v851_v41 = vadd.f32 %v819_v17, %v753_v37  ;;  %v327_v42 = vsel %vm294_vm14, %v1262_v19, 0.0  ;;  %vm392_vm15 = vcmp.eq.s32.totalorder %v1250_v9, %v1264_v20 }
  0x4d   :  { %v261_v8 = vadd.f32 %v229_v2, %v163_v40  ;;  %v441_v43 = vadd.f32 %v409_v38, %v343_v39  ;;  %v425_v44 = vsel %vm392_vm15, %v1266_v21, 0.0  ;;  %v1546_v45 = vadd.s32 72, %v1226_v1 }
  0x4e   :  { %v1549_v46 = vadd.s32 200, %v1226_v1  ;;  %1036 = vmatpush.msra.mxu3 %v851_v41  ;;  %vm113_vm0 = vcmp.eq.s32.totalorder %v1429_v30, %v1252_v13  ;;  %vm179_vm1 = vcmp.eq.s32.totalorder %v1429_v30, %v1256_v15  ;;  %vm277_vm2 = vcmp.eq.s32.totalorder %v1429_v30, %v1260_v18 }
  0x4f   :  { %v359_v47 = vadd.f32 %v327_v42, %v261_v8  ;;  %932 = vmatpush.msra.mxu0 %v441_v43  ;;  %vm507_vm3 = vcmp.eq.s32.totalorder %v1546_v45, %v1268_v22  ;;  %vm573_vm4 = vcmp.eq.s32.totalorder %v1546_v45, %v1272_v24  ;;  %vm671_vm5 = vcmp.eq.s32.totalorder %v1546_v45, %v1276_v26 }
  0x50   :  { %vm769_vm6 = vcmp.eq.s32.totalorder %v1546_v45, %v1280_v28  ;;  %v540_v3 = vsel %vm507_vm3, %v1270_v23, 0.0  ;;  %v606_v48 = vsel %vm573_vm4, %v1274_v25, 0.0  ;;  %v704_v49 = vsel %vm671_vm5, %v1278_v27, 0.0 }
  0x51   :  { %v457_v9 = vadd.f32 %v425_v44, %v359_v47  ;;  %v638_v50 = vadd.f32 %v606_v48, %v540_v3  ;;  %v802_v6 = vsel %vm769_vm6, %v1282_v29, 0.0  ;;  %vm523_vm7 = vcmp.eq.s32.totalorder %v1549_v46, %v1268_v22 }
  0x52   :  { %vm589_vm8 = vcmp.eq.s32.totalorder %v1549_v46, %v1272_v24  ;;  %v556_v51 = vsel %vm523_vm7, %v1270_v23, 0.0  ;;  %vm687_vm9 = vcmp.eq.s32.totalorder %v1549_v46, %v1276_v26  ;;  %vm785_vm10 = vcmp.eq.s32.totalorder %v1549_v46, %v1280_v28 }
  0x53   :  { %952 = vmatpush.msra.mxu1 %v457_v9  ;;  %v622_v52 = vsel %vm589_vm8, %v1274_v25, 0.0  ;;  %v736_v53 = vadd.f32 %v704_v49, %v638_v50  ;;  %v720_v57 = vsel %vm687_vm9, %v1278_v27, 0.0  ;;  %v818_v58 = vsel %vm785_vm10, %v1282_v29, 0.0 }
  0x54   :  { %v654_v54 = vadd.f32 %v622_v52, %v556_v51  ;;  %v146_v59 = vsel %vm113_vm0, %v1254_v14, 0.0  ;;  %v212_v7 = vsel %vm179_vm1, %v1258_v16, 0.0  ;;  %v310_v60 = vsel %vm277_vm2, %v1262_v19, 0.0 }
  0x55   :  { %vm375_vm11 = vcmp.eq.s32.totalorder %v1429_v30, %v1264_v20  ;;  %v834_v61 = vadd.f32 %v802_v6, %v736_v53  ;;  %v244_v63 = vadd.f32 %v212_v7, %v146_v59  ;;  %vm129_vm12 = vcmp.eq.s32.totalorder %v1432_v31, %v1252_v13 }
  0x56   :  { %v752_v62 = vadd.f32 %v720_v57, %v654_v54  ;;  %v408_v0 = vsel %vm375_vm11, %v1266_v21, 0.0  ;;  %vm195_vm13 = vcmp.eq.s32.totalorder %v1432_v31, %v1256_v15  ;;  %vm293_vm14 = vcmp.eq.s32.totalorder %v1432_v31, %v1260_v18 }
  0x57   :  { %vm391_vm15 = vcmp.eq.s32.totalorder %v1432_v31, %v1264_v20  ;;  %1017 = vmatpush.msra.mxu2 %v834_v61  ;;  %v342_v30 = vadd.f32 %v310_v60, %v244_v63  ;;  %v162_v11 = vsel %vm129_vm12, %v1254_v14, 0.0  ;;  %v228_v4 = vsel %vm195_vm13, %v1258_v16, 0.0 }
  0x58   :  { %v850_v10 = vadd.f32 %v818_v58, %v752_v62  ;;  %v260_v12 = vadd.f32 %v228_v4, %v162_v11  ;;  %v326_v17 = vsel %vm293_vm14, %v1262_v19, 0.0  ;;  %v424_v32 = vsel %vm391_vm15, %v1266_v21, 0.0 }
  0x59   :  { %v1609_v33 = vadd.s32 64, %v1226_v1  ;;  %v440_v34 = vadd.f32 %v408_v0, %v342_v30  ;;  %v1612_v5 = vadd.s32 192, %v1226_v1  ;;  %vm112_vm0 = vcmp.eq.s32.totalorder %v1485_v55, %v1252_v13 }
  0x5a   :  { %1037 = vmatpush.msra.mxu3 %v850_v10  ;;  %vm178_vm1 = vcmp.eq.s32.totalorder %v1485_v55, %v1256_v15  ;;  %v358_v31 = vadd.f32 %v326_v17, %v260_v12  ;;  %v145_v47 = vsel %vm112_vm0, %v1254_v14, 0.0  ;;  %vm276_vm10 = vcmp.eq.s32.totalorder %v1485_v55, %v1260_v18 }
  0x5b   :  { %vm506_vm2 = vcmp.eq.s32.totalorder %v1609_v33, %v1268_v22  ;;  %vm572_vm3 = vcmp.eq.s32.totalorder %v1609_v33, %v1272_v24  ;;  %vm670_vm4 = vcmp.eq.s32.totalorder %v1609_v33, %v1276_v26  ;;  %933 = vmatpush.msra.mxu0 %v440_v34  ;;  %vm768_vm5 = vcmp.eq.s32.totalorder %v1609_v33, %v1280_v28 }
  0x5c   :  { %v539_v35 = vsel %vm506_vm2, %v1270_v23, 0.0  ;;  %v605_v36 = vsel %vm572_vm3, %v1274_v25, 0.0  ;;  %v703_v37 = vsel %vm670_vm4, %v1278_v27, 0.0  ;;  %v456_v38 = vadd.f32 %v424_v32, %v358_v31 }
  0x5d   :  { %v637_v39 = vadd.f32 %v605_v36, %v539_v35  ;;  %v801_v40 = vsel %vm768_vm5, %v1282_v29, 0.0  ;;  %vm522_vm6 = vcmp.eq.s32.totalorder %v1612_v5, %v1268_v22  ;;  %vm588_vm7 = vcmp.eq.s32.totalorder %v1612_v5, %v1272_v24 }
  0x5e   :  { %v555_v2 = vsel %vm522_vm6, %v1270_v23, 0.0  ;;  %vm686_vm8 = vcmp.eq.s32.totalorder %v1612_v5, %v1276_v26  ;;  %vm784_vm9 = vcmp.eq.s32.totalorder %v1612_v5, %v1280_v28  ;;  %953 = vmatpush.msra.mxu1 %v456_v38  ;;  %v621_v8 = vsel %vm588_vm7, %v1274_v25, 0.0 }
  0x5f   :  { %v735_v41 = vadd.f32 %v703_v37, %v637_v39  ;;  %v719_v42 = vsel %vm686_vm8, %v1278_v27, 0.0  ;;  %v817_v43 = vsel %vm784_vm9, %v1282_v29, 0.0  ;;  %v653_v44 = vadd.f32 %v621_v8, %v555_v2 }
  0x60   :  { %v211_v9 = vsel %vm178_vm1, %v1258_v16, 0.0  ;;  %v309_v49 = vsel %vm276_vm10, %v1262_v19, 0.0  ;;  %vm374_vm11 = vcmp.eq.s32.totalorder %v1485_v55, %v1264_v20  ;;  %vm128_vm12 = vcmp.eq.s32.totalorder %v1488_v56, %v1252_v13 }
  0x61   :  { %v833_v3 = vadd.f32 %v801_v40, %v735_v41  ;;  %v243_v48 = vadd.f32 %v211_v9, %v145_v47  ;;  %v751_v50 = vadd.f32 %v719_v42, %v653_v44  ;;  %v407_v6 = vsel %vm374_vm11, %v1266_v21, 0.0 }
  0x62   :  { %vm194_vm13 = vcmp.eq.s32.totalorder %v1488_v56, %v1256_v15  ;;  %v161_v52 = vsel %vm128_vm12, %v1254_v14, 0.0  ;;  %vm292_vm14 = vcmp.eq.s32.totalorder %v1488_v56, %v1260_v18  ;;  %vm390_vm15 = vcmp.eq.s32.totalorder %v1488_v56, %v1264_v20 }
  0x63   :  { %1018 = vmatpush.msra.mxu2 %v833_v3  ;;  %v341_v51 = vadd.f32 %v309_v49, %v243_v48  ;;  %v227_v53 = vsel %vm194_vm13, %v1258_v16, 0.0  ;;  %v849_v54 = vadd.f32 %v817_v43, %v751_v50  ;;  %v325_v57 = vsel %vm292_vm14, %v1262_v19, 0.0 }
  0x64   :  { %v259_v55 = vadd.f32 %v227_v53, %v161_v52  ;;  %v423_v59 = vsel %vm390_vm15, %v1266_v21, 0.0  ;;  %v1669_v7 = vadd.s32 56, %v1226_v1  ;;  %v1672_v60 = vadd.s32 184, %v1226_v1 }
  0x65   :  { %v439_v58 = vadd.f32 %v407_v6, %v341_v51  ;;  %1038 = vmatpush.msra.mxu3 %v849_v54  ;;  %vm111_vm0 = vcmp.eq.s32.totalorder %v1546_v45, %v1252_v13  ;;  %vm177_vm1 = vcmp.eq.s32.totalorder %v1546_v45, %v1256_v15  ;;  %vm275_vm2 = vcmp.eq.s32.totalorder %v1546_v45, %v1260_v18 }
  0x66   :  { %v357_v61 = vadd.f32 %v325_v57, %v259_v55  ;;  %vm505_vm3 = vcmp.eq.s32.totalorder %v1669_v7, %v1268_v22  ;;  %vm571_vm4 = vcmp.eq.s32.totalorder %v1669_v7, %v1272_v24  ;;  %vm669_vm5 = vcmp.eq.s32.totalorder %v1669_v7, %v1276_v26 }
  0x67   :  { %934 = vmatpush.msra.mxu0 %v439_v58  ;;  %vm767_vm6 = vcmp.eq.s32.totalorder %v1669_v7, %v1280_v28  ;;  %v538_v62 = vsel %vm505_vm3, %v1270_v23, 0.0  ;;  %v604_v63 = vsel %vm571_vm4, %v1274_v25, 0.0  ;;  %v702_v0 = vsel %vm669_vm5, %v1278_v27, 0.0 }
  0x68   :  { %v455_v56 = vadd.f32 %v423_v59, %v357_v61  ;;  %v636_v10 = vadd.f32 %v604_v63, %v538_v62  ;;  %v800_v30 = vsel %vm767_vm6, %v1282_v29, 0.0  ;;  %vm521_vm7 = vcmp.eq.s32.totalorder %v1672_v60, %v1268_v22 }
  0x69   :  { %vm587_vm8 = vcmp.eq.s32.totalorder %v1672_v60, %v1272_v24  ;;  %v554_v11 = vsel %vm521_vm7, %v1270_v23, 0.0  ;;  %vm685_vm9 = vcmp.eq.s32.totalorder %v1672_v60, %v1276_v26  ;;  %vm783_vm10 = vcmp.eq.s32.totalorder %v1672_v60, %v1280_v28 }
  0x6a   :  { %954 = vmatpush.msra.mxu1 %v455_v56  ;;  %v620_v4 = vsel %vm587_vm8, %v1274_v25, 0.0  ;;  %v734_v12 = vadd.f32 %v702_v0, %v636_v10  ;;  %v718_v32 = vsel %vm685_vm9, %v1278_v27, 0.0  ;;  %v816_v34 = vsel %vm783_vm10, %v1282_v29, 0.0 }
  0x6b   :  { %v652_v17 = vadd.f32 %v620_v4, %v554_v11  ;;  %v144_v31 = vsel %vm111_vm0, %v1254_v14, 0.0  ;;  %v210_v35 = vsel %vm177_vm1, %v1258_v16, 0.0  ;;  %v308_v36 = vsel %vm275_vm2, %v1262_v19, 0.0 }
  0x6c   :  { %vm373_vm11 = vcmp.eq.s32.totalorder %v1546_v45, %v1264_v20  ;;  %v832_v37 = vadd.f32 %v800_v30, %v734_v12  ;;  %v242_v39 = vadd.f32 %v210_v35, %v144_v31  ;;  %vm127_vm12 = vcmp.eq.s32.totalorder %v1549_v46, %v1252_v13 }
  0x6d   :  { %v750_v38 = vadd.f32 %v718_v32, %v652_v17  ;;  %v406_v40 = vsel %vm373_vm11, %v1266_v21, 0.0  ;;  %vm193_vm13 = vcmp.eq.s32.totalorder %v1549_v46, %v1256_v15  ;;  %vm291_vm14 = vcmp.eq.s32.totalorder %v1549_v46, %v1260_v18 }
  0x6e   :  { %vm389_vm15 = vcmp.eq.s32.totalorder %v1549_v46, %v1264_v20  ;;  %1019 = vmatpush.msra.mxu2 %v832_v37  ;;  %v340_v45 = vadd.f32 %v308_v36, %v242_v39  ;;  %v160_v41 = vsel %vm127_vm12, %v1254_v14, 0.0  ;;  %v226_v8 = vsel %vm193_vm13, %v1258_v16, 0.0 }
  0x6f   :  { %v848_v2 = vadd.f32 %v816_v34, %v750_v38  ;;  %v258_v42 = vadd.f32 %v226_v8, %v160_v41  ;;  %v324_v43 = vsel %vm291_vm14, %v1262_v19, 0.0  ;;  %v422_v44 = vsel %vm389_vm15, %v1266_v21, 0.0 }
  0x70   :  { %v1732_v47 = vadd.s32 48, %v1226_v1  ;;  %v438_v9 = vadd.f32 %v406_v40, %v340_v45  ;;  %v1735_v3 = vadd.s32 176, %v1226_v1  ;;  %vm110_vm0 = vcmp.eq.s32.totalorder %v1609_v33, %v1252_v13 }
  0x71   :  { %1039 = vmatpush.msra.mxu3 %v848_v2  ;;  %vm176_vm1 = vcmp.eq.s32.totalorder %v1609_v33, %v1256_v15  ;;  %v356_v46 = vadd.f32 %v324_v43, %v258_v42  ;;  %v143_v61 = vsel %vm110_vm0, %v1254_v14, 0.0  ;;  %vm274_vm10 = vcmp.eq.s32.totalorder %v1609_v33, %v1260_v18 }
  0x72   :  { %vm504_vm2 = vcmp.eq.s32.totalorder %v1732_v47, %v1268_v22  ;;  %vm570_vm3 = vcmp.eq.s32.totalorder %v1732_v47, %v1272_v24  ;;  %vm668_vm4 = vcmp.eq.s32.totalorder %v1732_v47, %v1276_v26  ;;  %935 = vmatpush.msra.mxu0 %v438_v9  ;;  %vm766_vm5 = vcmp.eq.s32.totalorder %v1732_v47, %v1280_v28 }
  0x73   :  { %v537_v48 = vsel %vm504_vm2, %v1270_v23, 0.0  ;;  %v603_v49 = vsel %vm570_vm3, %v1274_v25, 0.0  ;;  %v701_v50 = vsel %vm668_vm4, %v1278_v27, 0.0  ;;  %v454_v6 = vadd.f32 %v422_v44, %v356_v46 }
  0x74   :  { %v635_v51 = vadd.f32 %v603_v49, %v537_v48  ;;  %v799_v52 = vsel %vm766_vm5, %v1282_v29, 0.0  ;;  %vm520_vm6 = vcmp.eq.s32.totalorder %v1735_v3, %v1268_v22  ;;  %vm586_vm7 = vcmp.eq.s32.totalorder %v1735_v3, %v1272_v24 }
  0x75   :  { %v553_v53 = vsel %vm520_vm6, %v1270_v23, 0.0  ;;  %vm684_vm8 = vcmp.eq.s32.totalorder %v1735_v3, %v1276_v26  ;;  %vm782_vm9 = vcmp.eq.s32.totalorder %v1735_v3, %v1280_v28  ;;  %955 = vmatpush.msra.mxu1 %v454_v6  ;;  %v619_v55 = vsel %vm586_vm7, %v1274_v25, 0.0 }
  0x76   :  { %v733_v54 = vadd.f32 %v701_v50, %v635_v51  ;;  %v717_v57 = vsel %vm684_vm8, %v1278_v27, 0.0  ;;  %v815_v58 = vsel %vm782_vm9, %v1282_v29, 0.0  ;;  %v651_v59 = vadd.f32 %v619_v55, %v553_v53 }
  0x77   :  { %v209_v56 = vsel %vm176_vm1, %v1258_v16, 0.0  ;;  %v307_v0 = vsel %vm274_vm10, %v1262_v19, 0.0  ;;  %vm372_vm11 = vcmp.eq.s32.totalorder %v1609_v33, %v1264_v20  ;;  %vm126_vm12 = vcmp.eq.s32.totalorder %v1612_v5, %v1252_v13 }
  0x78   :  { %v831_v62 = vadd.f32 %v799_v52, %v733_v54  ;;  %v241_v63 = vadd.f32 %v209_v56, %v143_v61  ;;  %v749_v10 = vadd.f32 %v717_v57, %v651_v59  ;;  %v405_v30 = vsel %vm372_vm11, %v1266_v21, 0.0 }
  0x79   :  { %vm192_vm13 = vcmp.eq.s32.totalorder %v1612_v5, %v1256_v15  ;;  %v159_v4 = vsel %vm126_vm12, %v1254_v14, 0.0  ;;  %vm290_vm14 = vcmp.eq.s32.totalorder %v1612_v5, %v1260_v18  ;;  %vm388_vm15 = vcmp.eq.s32.totalorder %v1612_v5, %v1264_v20 }
  0x7a   :  { %1020 = vmatpush.msra.mxu2 %v831_v62  ;;  %v339_v11 = vadd.f32 %v307_v0, %v241_v63  ;;  %v225_v12 = vsel %vm192_vm13, %v1258_v16, 0.0  ;;  %v847_v17 = vadd.f32 %v815_v58, %v749_v10  ;;  %v323_v32 = vsel %vm290_vm14, %v1262_v19, 0.0 }
  0x7b   :  { %v257_v33 = vadd.f32 %v225_v12, %v159_v4  ;;  %v421_v31 = vsel %vm388_vm15, %v1266_v21, 0.0  ;;  %v1792_v35 = vadd.s32 40, %v1226_v1  ;;  %v1795_v36 = vadd.s32 168, %v1226_v1 }
  0x7c   :  { %v437_v34 = vadd.f32 %v405_v30, %v339_v11  ;;  %1040 = vmatpush.msra.mxu3 %v847_v17  ;;  %vm109_vm0 = vcmp.eq.s32.totalorder %v1669_v7, %v1252_v13  ;;  %vm175_vm1 = vcmp.eq.s32.totalorder %v1669_v7, %v1256_v15  ;;  %vm273_vm2 = vcmp.eq.s32.totalorder %v1669_v7, %v1260_v18 }
  0x7d   :  { %v355_v37 = vadd.f32 %v323_v32, %v257_v33  ;;  %vm503_vm3 = vcmp.eq.s32.totalorder %v1792_v35, %v1268_v22  ;;  %vm569_vm4 = vcmp.eq.s32.totalorder %v1792_v35, %v1272_v24  ;;  %vm667_vm5 = vcmp.eq.s32.totalorder %v1792_v35, %v1276_v26 }
  0x7e   :  { %936 = vmatpush.msra.mxu0 %v437_v34  ;;  %vm765_vm6 = vcmp.eq.s32.totalorder %v1792_v35, %v1280_v28  ;;  %v536_v38 = vsel %vm503_vm3, %v1270_v23, 0.0  ;;  %v602_v39 = vsel %vm569_vm4, %v1274_v25, 0.0  ;;  %v700_v40 = vsel %vm667_vm5, %v1278_v27, 0.0 }
  0x7f   :  { %v453_v5 = vadd.f32 %v421_v31, %v355_v37  ;;  %v634_v2 = vadd.f32 %v602_v39, %v536_v38  ;;  %v798_v45 = vsel %vm765_vm6, %v1282_v29, 0.0  ;;  %vm519_vm7 = vcmp.eq.s32.totalorder %v1795_v36, %v1268_v22 }
  0x80   :  { %vm585_vm8 = vcmp.eq.s32.totalorder %v1795_v36, %v1272_v24  ;;  %v552_v41 = vsel %vm519_vm7, %v1270_v23, 0.0  ;;  %vm683_vm9 = vcmp.eq.s32.totalorder %v1795_v36, %v1276_v26  ;;  %vm781_vm10 = vcmp.eq.s32.totalorder %v1795_v36, %v1280_v28 }
  0x81   :  { %956 = vmatpush.msra.mxu1 %v453_v5  ;;  %v618_v8 = vsel %vm585_vm8, %v1274_v25, 0.0  ;;  %v732_v42 = vadd.f32 %v700_v40, %v634_v2  ;;  %v716_v44 = vsel %vm683_vm9, %v1278_v27, 0.0  ;;  %v814_v9 = vsel %vm781_vm10, %v1282_v29, 0.0 }
  0x82   :  { %v650_v43 = vadd.f32 %v618_v8, %v552_v41  ;;  %v142_v46 = vsel %vm109_vm0, %v1254_v14, 0.0  ;;  %v208_v48 = vsel %vm175_vm1, %v1258_v16, 0.0  ;;  %v306_v49 = vsel %vm273_vm2, %v1262_v19, 0.0 }
  0x83   :  { %vm371_vm11 = vcmp.eq.s32.totalorder %v1669_v7, %v1264_v20  ;;  %v830_v50 = vadd.f32 %v798_v45, %v732_v42  ;;  %v240_v51 = vadd.f32 %v208_v48, %v142_v46  ;;  %vm125_vm12 = vcmp.eq.s32.totalorder %v1672_v60, %v1252_v13 }
  0x84   :  { %v748_v6 = vadd.f32 %v716_v44, %v650_v43  ;;  %v404_v52 = vsel %vm371_vm11, %v1266_v21, 0.0  ;;  %vm191_vm13 = vcmp.eq.s32.totalorder %v1672_v60, %v1256_v15  ;;  %vm289_vm14 = vcmp.eq.s32.totalorder %v1672_v60, %v1260_v18 }
  0x85   :  { %vm387_vm15 = vcmp.eq.s32.totalorder %v1672_v60, %v1264_v20  ;;  %1021 = vmatpush.msra.mxu2 %v830_v50  ;;  %v338_v7 = vadd.f32 %v306_v49, %v240_v51  ;;  %v158_v54 = vsel %vm125_vm12, %v1254_v14, 0.0  ;;  %v224_v55 = vsel %vm191_vm13, %v1258_v16, 0.0 }
  0x86   :  { %v846_v53 = vadd.f32 %v814_v9, %v748_v6  ;;  %v256_v57 = vadd.f32 %v224_v55, %v158_v54  ;;  %v322_v58 = vsel %vm289_vm14, %v1262_v19, 0.0  ;;  %v420_v59 = vsel %vm387_vm15, %v1266_v21, 0.0  ;;  %v890_v9 = vld [vmem:[#allocation8] sm:$0xff] }
  0x87   :  { %v1855_v61 = vadd.s32 32, %v1226_v1  ;;  %v436_v56 = vadd.f32 %v404_v52, %v338_v7  ;;  %v1858_v62 = vadd.s32 160, %v1226_v1  ;;  %vm108_vm0 = vcmp.eq.s32.totalorder %v1732_v47, %v1252_v13  ;;  %924 = vst [vmem:[#allocation1] ss:$2 sm:$0xff] %v890_v9 }
  0x88   :  { %1041 = vmatpush.msra.mxu3 %v846_v53  ;;  %vm174_vm1 = vcmp.eq.s32.totalorder %v1732_v47, %v1256_v15  ;;  %v354_v60 = vadd.f32 %v322_v58, %v256_v57  ;;  %v141_v37 = vsel %vm108_vm0, %v1254_v14, 0.0  ;;  %vm272_vm10 = vcmp.eq.s32.totalorder %v1732_v47, %v1260_v18 }
  0x89   :  { %vm502_vm2 = vcmp.eq.s32.totalorder %v1855_v61, %v1268_v22  ;;  %vm568_vm3 = vcmp.eq.s32.totalorder %v1855_v61, %v1272_v24  ;;  %vm666_vm4 = vcmp.eq.s32.totalorder %v1855_v61, %v1276_v26  ;;  %937 = vmatpush.msra.mxu0 %v436_v56  ;;  %vm764_vm5 = vcmp.eq.s32.totalorder %v1855_v61, %v1280_v28 }
  0x8a   :  { %v535_v63 = vsel %vm502_vm2, %v1270_v23, 0.0  ;;  %v601_v0 = vsel %vm568_vm3, %v1274_v25, 0.0  ;;  %v699_v10 = vsel %vm666_vm4, %v1278_v27, 0.0  ;;  %v452_v30 = vadd.f32 %v420_v59, %v354_v60 }
  0x8b   :  { %v633_v11 = vadd.f32 %v601_v0, %v535_v63  ;;  %v797_v4 = vsel %vm764_vm5, %v1282_v29, 0.0  ;;  %vm518_vm6 = vcmp.eq.s32.totalorder %v1858_v62, %v1268_v22  ;;  %vm584_vm7 = vcmp.eq.s32.totalorder %v1858_v62, %v1272_v24 }
  0x8c   :  { %v551_v12 = vsel %vm518_vm6, %v1270_v23, 0.0  ;;  %vm682_vm8 = vcmp.eq.s32.totalorder %v1858_v62, %v1276_v26  ;;  %vm780_vm9 = vcmp.eq.s32.totalorder %v1858_v62, %v1280_v28  ;;  %957 = vmatpush.msra.mxu1 %v452_v30  ;;  %v617_v33 = vsel %vm584_vm7, %v1274_v25, 0.0 }
  0x8d   :  { %v731_v17 = vadd.f32 %v699_v10, %v633_v11  ;;  %v715_v32 = vsel %vm682_vm8, %v1278_v27, 0.0  ;;  %v813_v34 = vsel %vm780_vm9, %v1282_v29, 0.0  ;;  %v649_v31 = vadd.f32 %v617_v33, %v551_v12 }
  0x8e   :  { %v207_v5 = vsel %vm174_vm1, %v1258_v16, 0.0  ;;  %v305_v40 = vsel %vm272_vm10, %v1262_v19, 0.0  ;;  %vm370_vm11 = vcmp.eq.s32.totalorder %v1732_v47, %v1264_v20  ;;  %vm124_vm12 = vcmp.eq.s32.totalorder %v1735_v3, %v1252_v13  ;;  %v1964_v30 = vld.sshfl [vmem:[#allocation1] sm:$0xff pattern:$0x75316420] }
  0x8f   :  { %v829_v38 = vadd.f32 %v797_v4, %v731_v17  ;;  %v239_v39 = vadd.f32 %v207_v5, %v141_v37  ;;  %v747_v2 = vadd.f32 %v715_v32, %v649_v31  ;;  %v403_v45 = vsel %vm370_vm11, %v1266_v21, 0.0  ;;  %v1967_v33 = vld.sshfl [vmem:[#allocation1 + $0x8] sm:$0xff pattern:$0x75316420]  ;;  %v971_v32 = vld [vmem:[#allocation8 + $0x8] sm:$0xff] }
  0x90   :  { %vm190_vm13 = vcmp.eq.s32.totalorder %v1735_v3, %v1256_v15  ;;  %v157_v8 = vsel %vm124_vm12, %v1254_v14, 0.0  ;;  %vm288_vm14 = vcmp.eq.s32.totalorder %v1735_v3, %v1260_v18  ;;  %vm386_vm15 = vcmp.eq.s32.totalorder %v1735_v3, %v1264_v20  ;;  %1006 = vst [vmem:[#allocation1] ss:$2 sm:$0xff] %v971_v32 }
  0x91   :  { %1022 = vmatpush.msra.mxu2 %v829_v38  ;;  %v337_v41 = vadd.f32 %v305_v40, %v239_v39  ;;  %v223_v42 = vsel %vm190_vm13, %v1258_v16, 0.0  ;;  %v845_v43 = vadd.f32 %v813_v34, %v747_v2  ;;  %v321_v44 = vsel %vm288_vm14, %v1262_v19, 0.0 }
  0x92   :  { %v255_v47 = vadd.f32 %v223_v42, %v157_v8  ;;  %v419_v48 = vsel %vm386_vm15, %v1266_v21, 0.0  ;;  %v1915_v49 = vadd.s32 24, %v1226_v1  ;;  %v1918_v50 = vadd.s32 152, %v1226_v1 }
  0x93   :  { %v435_v46 = vadd.f32 %v403_v45, %v337_v41  ;;  %1042 = vmatpush.msra.mxu3 %v845_v43  ;;  %vm107_vm0 = vcmp.eq.s32.totalorder %v1792_v35, %v1252_v13  ;;  %vm173_vm1 = vcmp.eq.s32.totalorder %v1792_v35, %v1256_v15  ;;  %vm271_vm2 = vcmp.eq.s32.totalorder %v1792_v35, %v1260_v18 }
  0x94   :  { %v353_v6 = vadd.f32 %v321_v44, %v255_v47  ;;  %vm501_vm3 = vcmp.eq.s32.totalorder %v1915_v49, %v1268_v22  ;;  %vm567_vm4 = vcmp.eq.s32.totalorder %v1915_v49, %v1272_v24  ;;  %vm665_vm5 = vcmp.eq.s32.totalorder %v1915_v49, %v1276_v26 }
  0x95   :  { %938 = vmatpush.msra.mxu0 %v435_v46  ;;  %vm763_vm6 = vcmp.eq.s32.totalorder %v1915_v49, %v1280_v28  ;;  %v534_v51 = vsel %vm501_vm3, %v1270_v23, 0.0  ;;  %v600_v52 = vsel %vm567_vm4, %v1274_v25, 0.0  ;;  %v698_v53 = vsel %vm665_vm5, %v1278_v27, 0.0 }
  0x96   :  { %v451_v3 = vadd.f32 %v419_v48, %v353_v6  ;;  %v632_v7 = vadd.f32 %v600_v52, %v534_v51  ;;  %v796_v54 = vsel %vm763_vm6, %v1282_v29, 0.0  ;;  %vm517_vm7 = vcmp.eq.s32.totalorder %v1918_v50, %v1268_v22 }
  0x97   :  { %vm583_vm8 = vcmp.eq.s32.totalorder %v1918_v50, %v1272_v24  ;;  %v550_v55 = vsel %vm517_vm7, %v1270_v23, 0.0  ;;  %vm681_vm9 = vcmp.eq.s32.totalorder %v1918_v50, %v1276_v26  ;;  %vm779_vm10 = vcmp.eq.s32.totalorder %v1918_v50, %v1280_v28 }
  0x98   :  { %958 = vmatpush.msra.mxu1 %v451_v3  ;;  %v616_v57 = vsel %vm583_vm8, %v1274_v25, 0.0  ;;  %v730_v58 = vadd.f32 %v698_v53, %v632_v7  ;;  %v714_v56 = vsel %vm681_vm9, %v1278_v27, 0.0  ;;  %v812_v60 = vsel %vm779_vm10, %v1282_v29, 0.0 }
  0x99   :  { %v648_v59 = vadd.f32 %v616_v57, %v550_v55  ;;  %v140_v63 = vsel %vm107_vm0, %v1254_v14, 0.0  ;;  %v206_v0 = vsel %vm173_vm1, %v1258_v16, 0.0  ;;  %v304_v10 = vsel %vm271_vm2, %v1262_v19, 0.0 }
  0x9a   :  { %vm369_vm11 = vcmp.eq.s32.totalorder %v1792_v35, %v1264_v20  ;;  %v828_v11 = vadd.f32 %v796_v54, %v730_v58  ;;  %v238_v12 = vadd.f32 %v206_v0, %v140_v63  ;;  %vm123_vm12 = vcmp.eq.s32.totalorder %v1795_v36, %v1252_v13 }
  0x9b   :  { %v746_v4 = vadd.f32 %v714_v56, %v648_v59  ;;  %v402_v17 = vsel %vm369_vm11, %v1266_v21, 0.0  ;;  %vm189_vm13 = vcmp.eq.s32.totalorder %v1795_v36, %v1256_v15  ;;  %vm287_vm14 = vcmp.eq.s32.totalorder %v1795_v36, %v1260_v18 }
  0x9c   :  { %vm385_vm15 = vcmp.eq.s32.totalorder %v1795_v36, %v1264_v20  ;;  %1023 = vmatpush.msra.mxu2 %v828_v11  ;;  %v336_v34 = vadd.f32 %v304_v10, %v238_v12  ;;  %v156_v31 = vsel %vm123_vm12, %v1254_v14, 0.0  ;;  %v222_v37 = vsel %vm189_vm13, %v1258_v16, 0.0 }
  0x9d   :  { %v844_v35 = vadd.f32 %v812_v60, %v746_v4  ;;  %v254_v5 = vadd.f32 %v222_v37, %v156_v31  ;;  %v320_v38 = vsel %vm287_vm14, %v1262_v19, 0.0  ;;  %v418_v39 = vsel %vm385_vm15, %v1266_v21, 0.0 }
  0x9e   :  { %v1982_v40 = vadd.s32 16, %v1226_v1  ;;  %v434_v2 = vadd.f32 %v402_v17, %v336_v34  ;;  %v1985_v36 = vadd.s32 144, %v1226_v1  ;;  %vm106_vm0 = vcmp.eq.s32.totalorder %v1855_v61, %v1252_v13 }
  0x9f   :  { %1043 = vmatpush.msra.mxu3 %v844_v35  ;;  %vm172_vm1 = vcmp.eq.s32.totalorder %v1855_v61, %v1256_v15  ;;  %v352_v45 = vadd.f32 %v320_v38, %v254_v5  ;;  %v139_v52 = vsel %vm106_vm0, %v1254_v14, 0.0  ;;  %vm270_vm10 = vcmp.eq.s32.totalorder %v1855_v61, %v1260_v18 }
  0xa0   :  { %vm500_vm2 = vcmp.eq.s32.totalorder %v1982_v40, %v1268_v22  ;;  %vm566_vm3 = vcmp.eq.s32.totalorder %v1982_v40, %v1272_v24  ;;  %vm664_vm4 = vcmp.eq.s32.totalorder %v1982_v40, %v1276_v26  ;;  %939 = vmatpush.msra.mxu0 %v434_v2  ;;  %vm762_vm5 = vcmp.eq.s32.totalorder %v1982_v40, %v1280_v28 }
  0xa1   :  { %v533_v41 = vsel %vm500_vm2, %v1270_v23, 0.0  ;;  %v599_v8 = vsel %vm566_vm3, %v1274_v25, 0.0  ;;  %v697_v42 = vsel %vm664_vm4, %v1278_v27, 0.0  ;;  %v450_v43 = vadd.f32 %v418_v39, %v352_v45 }
  0xa2   :  { %v631_v47 = vadd.f32 %v599_v8, %v533_v41  ;;  %v795_v44 = vsel %vm762_vm5, %v1282_v29, 0.0  ;;  %vm516_vm6 = vcmp.eq.s32.totalorder %v1985_v36, %v1268_v22  ;;  %vm582_vm7 = vcmp.eq.s32.totalorder %v1985_v36, %v1272_v24 }
  0xa3   :  { %v549_v9 = vsel %vm516_vm6, %v1270_v23, 0.0  ;;  %vm680_vm8 = vcmp.eq.s32.totalorder %v1985_v36, %v1276_v26  ;;  %vm778_vm9 = vcmp.eq.s32.totalorder %v1985_v36, %v1280_v28  ;;  %959 = vmatpush.msra.mxu1 %v450_v43  ;;  %v615_v48 = vsel %vm582_vm7, %v1274_v25, 0.0 }
  0xa4   :  { %v729_v46 = vadd.f32 %v697_v42, %v631_v47  ;;  %v713_v6 = vsel %vm680_vm8, %v1278_v27, 0.0  ;;  %v811_v3 = vsel %vm778_vm9, %v1282_v29, 0.0  ;;  %v647_v51 = vadd.f32 %v615_v48, %v549_v9 }
  0xa5   :  { %v205_v53 = vsel %vm172_vm1, %v1258_v16, 0.0  ;;  %v303_v55 = vsel %vm270_vm10, %v1262_v19, 0.0  ;;  %vm368_vm11 = vcmp.eq.s32.totalorder %v1855_v61, %v1264_v20  ;;  %vm122_vm12 = vcmp.eq.s32.totalorder %v1858_v62, %v1252_v13 }
  0xa6   :  { %v827_v7 = vadd.f32 %v795_v44, %v729_v46  ;;  %v237_v54 = vadd.f32 %v205_v53, %v139_v52  ;;  %v745_v57 = vadd.f32 %v713_v6, %v647_v51  ;;  %v401_v58 = vsel %vm368_vm11, %v1266_v21, 0.0 }
  0xa7   :  { %vm188_vm13 = vcmp.eq.s32.totalorder %v1858_v62, %v1256_v15  ;;  %v155_v56 = vsel %vm122_vm12, %v1254_v14, 0.0  ;;  %vm286_vm14 = vcmp.eq.s32.totalorder %v1858_v62, %v1260_v18  ;;  %vm384_vm15 = vcmp.eq.s32.totalorder %v1858_v62, %v1264_v20 }
  0xa8   :  { %1024 = vmatpush.msra.mxu2 %v827_v7  ;;  %v335_v59 = vadd.f32 %v303_v55, %v237_v54  ;;  %v221_v60 = vsel %vm188_vm13, %v1258_v16, 0.0  ;;  %v843_v63 = vadd.f32 %v811_v3, %v745_v57  ;;  %v319_v0 = vsel %vm286_vm14, %v1262_v19, 0.0 }
  0xa9   :  { %v253_v61 = vadd.f32 %v221_v60, %v155_v56  ;;  %v417_v11 = vsel %vm384_vm15, %v1266_v21, 0.0  ;;  %v2042_v4 = vadd.s32 8, %v1226_v1  ;;  %v2045_v12 = vadd.s32 136, %v1226_v1 }
  0xaa   :  { %v433_v10 = vadd.f32 %v401_v58, %v335_v59  ;;  %1044 = vmatpush.msra.mxu3 %v843_v63  ;;  %vm105_vm0 = vcmp.eq.s32.totalorder %v1915_v49, %v1252_v13  ;;  %vm171_vm1 = vcmp.eq.s32.totalorder %v1915_v49, %v1256_v15  ;;  %vm269_vm2 = vcmp.eq.s32.totalorder %v1915_v49, %v1260_v18 }
  0xab   :  { %v351_v17 = vadd.f32 %v319_v0, %v253_v61  ;;  %vm499_vm3 = vcmp.eq.s32.totalorder %v2042_v4, %v1268_v22  ;;  %vm565_vm4 = vcmp.eq.s32.totalorder %v2042_v4, %v1272_v24  ;;  %vm663_vm5 = vcmp.eq.s32.totalorder %v2042_v4, %v1276_v26 }
  0xac   :  { %940 = vmatpush.msra.mxu0 %v433_v10  ;;  %vm761_vm6 = vcmp.eq.s32.totalorder %v2042_v4, %v1280_v28  ;;  %v532_v32 = vsel %vm499_vm3, %v1270_v23, 0.0  ;;  %v598_v35 = vsel %vm565_vm4, %v1274_v25, 0.0  ;;  %v696_v34 = vsel %vm663_vm5, %v1278_v27, 0.0 }
  0xad   :  { %v449_v62 = vadd.f32 %v417_v11, %v351_v17  ;;  %v630_v31 = vadd.f32 %v598_v35, %v532_v32  ;;  %v794_v37 = vsel %vm761_vm6, %v1282_v29, 0.0  ;;  %vm515_vm7 = vcmp.eq.s32.totalorder %v2045_v12, %v1268_v22  ;;  %v1007_v32 = vld.sshfl [vmem:[#allocation1] sm:$0xff pattern:$0x75316420] }
  0xae   :  { %vm581_vm8 = vcmp.eq.s32.totalorder %v2045_v12, %v1272_v24  ;;  %v548_v5 = vsel %vm515_vm7, %v1270_v23, 0.0  ;;  %vm679_vm9 = vcmp.eq.s32.totalorder %v2045_v12, %v1276_v26  ;;  %vm777_vm10 = vcmp.eq.s32.totalorder %v2045_v12, %v1280_v28 }
  0xaf   :  { %960 = vmatpush.msra.mxu1 %v449_v62  ;;  %v614_v38 = vsel %vm581_vm8, %v1274_v25, 0.0  ;;  %v728_v39 = vadd.f32 %v696_v34, %v630_v31  ;;  %v712_v45 = vsel %vm679_vm9, %v1278_v27, 0.0  ;;  %v810_v41 = vsel %vm777_vm10, %v1282_v29, 0.0  ;;  %v1008_v34 = vld.sshfl [vmem:[#allocation1 + $0x8] sm:$0xff pattern:$0x75316420] }
  0xb0   :  { %v646_v2 = vadd.f32 %v614_v38, %v548_v5  ;;  %v138_v8 = vsel %vm105_vm0, %v1254_v14, 0.0  ;;  %v204_v42 = vsel %vm171_vm1, %v1258_v16, 0.0  ;;  %v302_v43 = vsel %vm269_vm2, %v1262_v19, 0.0 }
  0xb1   :  { %vm367_vm11 = vcmp.eq.s32.totalorder %v1915_v49, %v1264_v20  ;;  %v826_v47 = vadd.f32 %v794_v37, %v728_v39  ;;  %v236_v9 = vadd.f32 %v204_v42, %v138_v8  ;;  %vm121_vm12 = vcmp.eq.s32.totalorder %v1918_v50, %v1252_v13 }
  0xb2   :  { %v744_v44 = vadd.f32 %v712_v45, %v646_v2  ;;  %v400_v46 = vsel %vm367_vm11, %v1266_v21, 0.0  ;;  %vm187_vm13 = vcmp.eq.s32.totalorder %v1918_v50, %v1256_v15  ;;  %vm285_vm14 = vcmp.eq.s32.totalorder %v1918_v50, %v1260_v18 }
  0xb3   :  { %vm383_vm15 = vcmp.eq.s32.totalorder %v1918_v50, %v1264_v20  ;;  %1025 = vmatpush.msra.mxu2 %v826_v47  ;;  %v334_v49 = vadd.f32 %v302_v43, %v236_v9  ;;  %v154_v6 = vsel %vm121_vm12, %v1254_v14, 0.0  ;;  %v220_v3 = vsel %vm187_vm13, %v1258_v16, 0.0 }
  0xb4   :  { %v842_v48 = vadd.f32 %v810_v41, %v744_v44  ;;  %v252_v51 = vadd.f32 %v220_v3, %v154_v6  ;;  %v318_v52 = vsel %vm285_vm14, %v1262_v19, 0.0  ;;  %v416_v53 = vsel %vm383_vm15, %v1266_v21, 0.0 }
  0xb5   :  { %vm498_vm0 = vcmp.eq.s32.totalorder %v1226_v1, %v1268_v22  ;;  %v432_v7 = vadd.f32 %v400_v46, %v334_v49  ;;  %vm564_vm1 = vcmp.eq.s32.totalorder %v1226_v1, %v1272_v24  ;;  %vm662_vm2 = vcmp.eq.s32.totalorder %v1226_v1, %v1276_v26 }
  0xb6   :  { %1045 = vmatpush.msra.mxu3 %v842_v48  ;;  %v531_v54 = vsel %vm498_vm0, %v1270_v23, 0.0  ;;  %v350_v50 = vadd.f32 %v318_v52, %v252_v51  ;;  %v597_v55 = vsel %vm564_vm1, %v1274_v25, 0.0  ;;  %v695_v57 = vsel %vm662_vm2, %v1278_v27, 0.0 }
  0xb7   :  { %vm760_vm3 = vcmp.eq.s32.totalorder %v1226_v1, %v1280_v28  ;;  %941 = vmatpush.msra.mxu0 %v432_v7  ;;  %v629_v58 = vadd.f32 %v597_v55, %v531_v54  ;;  %v2117_v56 = vadd.s32 128, %v1226_v1  ;;  %vm104_vm4 = vcmp.eq.s32.totalorder %v1982_v40, %v1252_v13 }
  0xb8   :  { %v793_v59 = vsel %vm760_vm3, %v1282_v29, 0.0  ;;  %v448_v60 = vadd.f32 %v416_v53, %v350_v50  ;;  %v137_v63 = vsel %vm104_vm4, %v1254_v14, 0.0  ;;  %vm170_vm5 = vcmp.eq.s32.totalorder %v1982_v40, %v1256_v15 }
  0xb9   :  { %vm268_vm6 = vcmp.eq.s32.totalorder %v1982_v40, %v1260_v18  ;;  %v727_v61 = vadd.f32 %v695_v57, %v629_v58  ;;  %vm514_vm7 = vcmp.eq.s32.totalorder %v2117_v56, %v1268_v22  ;;  %vm580_vm8 = vcmp.eq.s32.totalorder %v2117_v56, %v1272_v24 }
  0xba   :  { %vm678_vm9 = vcmp.eq.s32.totalorder %v2117_v56, %v1276_v26  ;;  %961 = vmatpush.msra.mxu1 %v448_v60  ;;  %v547_v0 = vsel %vm514_vm7, %v1270_v23, 0.0  ;;  %v613_v10 = vsel %vm580_vm8, %v1274_v25, 0.0  ;;  %vm776_vm10 = vcmp.eq.s32.totalorder %v2117_v56, %v1280_v28 }
  0xbb   :  { %v711_v11 = vsel %vm678_vm9, %v1278_v27, 0.0  ;;  %v825_v17 = vadd.f32 %v793_v59, %v727_v61  ;;  %v645_v62 = vadd.f32 %v613_v10, %v547_v0  ;;  %v809_v22 = vsel %vm776_vm10, %v1282_v29, 0.0 }
  0xbc   :  { %v203_v24 = vsel %vm170_vm5, %v1258_v16, 0.0  ;;  %v301_v23 = vsel %vm268_vm6, %v1262_v19, 0.0  ;;  %vm366_vm11 = vcmp.eq.s32.totalorder %v1982_v40, %v1264_v20  ;;  %vm120_vm12 = vcmp.eq.s32.totalorder %v1985_v36, %v1252_v13 }
  0xbd   :  { %v235_v35 = vadd.f32 %v203_v24, %v137_v63  ;;  %1026 = vmatpush.msra.mxu2 %v825_v17  ;;  %v743_v25 = vadd.f32 %v711_v11, %v645_v62  ;;  %v399_v26 = vsel %vm366_vm11, %v1266_v21, 0.0  ;;  %v153_v27 = vsel %vm120_vm12, %v1254_v14, 0.0 }
  0xbe   :  { %vm186_vm13 = vcmp.eq.s32.totalorder %v1985_v36, %v1256_v15  ;;  %1027 = vmatmul.f32.vlgmr.msra.gmra.mxu2 %v1007_v32  ;;  %vm284_vm14 = vcmp.eq.s32.totalorder %v1985_v36, %v1260_v18  ;;  %vm382_vm15 = vcmp.eq.s32.totalorder %v1985_v36, %v1264_v20  ;;  %vm103_vm0 = vcmp.eq.s32.totalorder %v2042_v4, %v1252_v13 }
  0xbf   :  { %v333_v28 = vadd.f32 %v301_v23, %v235_v35  ;;  %v219_v29 = vsel %vm186_vm13, %v1258_v16, 0.0  ;;  %v841_v40 = vadd.f32 %v809_v22, %v743_v25  ;;  %v317_v37 = vsel %vm284_vm14, %v1262_v19, 0.0 }
  0xc0   :  { %v251_v31 = vadd.f32 %v219_v29, %v153_v27  ;;  %v415_v5 = vsel %vm382_vm15, %v1266_v21, 0.0  ;;  %vm169_vm1 = vcmp.eq.s32.totalorder %v2042_v4, %v1256_v15  ;;  %vm267_vm2 = vcmp.eq.s32.totalorder %v2042_v4, %v1260_v18 }
  0xc1   :  { %v431_v38 = vadd.f32 %v399_v26, %v333_v28  ;;  %1046 = vmatpush.msra.mxu3 %v841_v40  ;;  %v136_v36 = vsel %vm103_vm0, %v1254_v14, 0.0  ;;  %v202_v2 = vsel %vm169_vm1, %v1258_v16, 0.0  ;;  %v300_v45 = vsel %vm267_vm2, %v1262_v19, 0.0 }
  0xc2   :  { %v349_v39 = vadd.f32 %v317_v37, %v251_v31  ;;  %1047 = vmatmul.f32.vlgmr.msra.gmra.mxu3 %v1008_v34  ;;  %v234_v41 = vadd.f32 %v202_v2, %v136_v36  ;;  %vm365_vm3 = vcmp.eq.s32.totalorder %v2042_v4, %v1264_v20  ;;  %vm119_vm4 = vcmp.eq.s32.totalorder %v2045_v12, %v1252_v13 }
  0xc3   :  { %942 = vmatpush.msra.mxu0 %v431_v38  ;;  %v398_v42 = vsel %vm365_vm3, %v1266_v21, 0.0  ;;  %v152_v43 = vsel %vm119_vm4, %v1254_v14, 0.0  ;;  %vm185_vm5 = vcmp.eq.s32.totalorder %v2045_v12, %v1256_v15  ;;  %vm283_vm6 = vcmp.eq.s32.totalorder %v2045_v12, %v1260_v18 }
  0xc4   :  { %v447_v8 = vadd.f32 %v415_v5, %v349_v39  ;;  %v332_v47 = vadd.f32 %v300_v45, %v234_v41  ;;  %v218_v44 = vsel %vm185_vm5, %v1258_v16, 0.0  ;;  %vm381_vm7 = vcmp.eq.s32.totalorder %v2045_v12, %v1264_v20 }
  0xc5   :  { %v250_v4 = vadd.f32 %v218_v44, %v152_v43  ;;  %v316_v9 = vsel %vm283_vm6, %v1262_v19, 0.0  ;;  %v414_v46 = vsel %vm381_vm7, %v1266_v21, 0.0  ;;  %vm102_vm8 = vcmp.eq.s32.totalorder %v1226_v1, %v1252_v13 }
  0xc6   :  { %962 = vmatpush.msra.mxu1 %v447_v8  ;;  %v430_v48 = vadd.f32 %v398_v42, %v332_v47  ;;  %v135_v49 = vsel %vm102_vm8, %v1254_v14, 0.0  ;;  %vm168_vm9 = vcmp.eq.s32.totalorder %v1226_v1, %v1256_v15  ;;  %vm266_vm10 = vcmp.eq.s32.totalorder %v1226_v1, %v1260_v18 }
  0xc7   :  { %v348_v6 = vadd.f32 %v316_v9, %v250_v4  ;;  %v201_v12 = vsel %vm168_vm9, %v1258_v16, 0.0  ;;  %v299_v3 = vsel %vm266_vm10, %v1262_v19, 0.0  ;;  %vm364_vm11 = vcmp.eq.s32.totalorder %v1226_v1, %v1264_v20 }
  0xc8   :  { %943 = vmatpush.msra.mxu0 %v430_v48  ;;  %v233_v51 = vadd.f32 %v201_v12, %v135_v49  ;;  %v397_v52 = vsel %vm364_vm11, %v1266_v21, 0.0  ;;  %vm118_vm12 = vcmp.eq.s32.totalorder %v2117_v56, %v1252_v13  ;;  %vm184_vm13 = vcmp.eq.s32.totalorder %v2117_v56, %v1256_v15 }
  0xc9   :  { %v446_v53 = vadd.f32 %v414_v46, %v348_v6  ;;  %v151_v7 = vsel %vm118_vm12, %v1254_v14, 0.0  ;;  %v217_v54 = vsel %vm184_vm13, %v1258_v16, 0.0  ;;  %vm282_vm14 = vcmp.eq.s32.totalorder %v2117_v56, %v1260_v18 }
  0xca   :  { %v331_v50 = vadd.f32 %v299_v3, %v233_v51  ;;  %v249_v1 = vadd.f32 %v217_v54, %v151_v7  ;;  %v315_v55 = vsel %vm282_vm14, %v1262_v19, 0.0  ;;  %vm380_vm15 = vcmp.eq.s32.totalorder %v2117_v56, %v1264_v20 }
  0xcb   :  { %963 = vmatpush.msra.mxu1 %v446_v53  ;;  %v413_v13 = vsel %vm380_vm15, %v1266_v21, 0.0 }
  0xcc   :  { %v429_v57 = vadd.f32 %v397_v52, %v331_v50  ;;  %v347_v15 = vadd.f32 %v315_v55, %v249_v1 }
  0xce   :  { %944 = vmatpush.msra.mxu0 %v429_v57  ;;  %v445_v58 = vadd.f32 %v413_v13, %v347_v15 }
  0xcf   :  { %945 = vmatmul.f32.vlgmr.msra.gmra.mxu0 %v1964_v30 }
  0xd0   :  { %964 = vmatpush.msra.mxu1 %v445_v58 }
  0xd1   :  { %965 = vmatmul.f32.vlgmr.msra.gmra.mxu1 %v1967_v33 }
 0x141   :  { %v1028_v14 = vpop.f32.mrf.mxu2 }
 0x145   :  { %v1048_v16 = vpop.f32.mrf.mxu3 }
 0x146   :  { %v1049_v18 = vadd.f32 %v1048_v16, %v1028_v14 }
 0x148   :  { %1052 = vst [vmem:[#allocation9 + $0x4] sm:$0xf] %v1049_v18 }
 0x14c   :  { %v946_v19 = vpop.f32.mrf.mxu0 }
 0x14e   :  { %v966_v20 = vpop.f32.mrf.mxu1 }
 0x14f   :  { %v967_v21 = vadd.f32 %v966_v20, %v946_v19 }
 0x151   :  { %969 = vst [vmem:[#allocation9] sm:$0xf] %v967_v21 }
 0x152   :  { %1065 = dma.vmem_to_hbm [thread:$0]  %s1058_s29, 128, %s1060_s5, [#allocation5], %s1184_s20, %s1184_s20, %s1185_s21  }
 0x153   :  { %1181 = dma.done.wait [#allocation5], 128  }
 0x154   :  { %1182 = vsyncadd [#allocation5], 4294967168 }
 0x155   :  { %1070 = vsyncpa [#allocation4], 1 }
 0x156   :  { %1071 = vsyncpa [#allocation7], 1 }
 0x157   :  { %1072 = vsyncpa [#allocation5], 1 }

</bundles_post_ra>
